<compile_context>
chip_gen: v5e
topology: v5e:2x2
jax: 0.10.0
libtpu: 0.0.40
codegen_flags: <defaults>
</compile_context>

<pallas_src>
import functools
import math

import jax
import jax.numpy as jnp
from jax import lax
from jax.experimental import pallas as pl
from jax.experimental.pallas import tpu as pltpu


CFG = dict(
    image_size=16,
    patch=8,
    channels=3,
    hidden=32,
    heads=4,
    layers=2,
    intermediate=64,
    num_classes=8,
    ln_eps=1e-12,
)

SUB = 8          # sublane multiple: pad sequence length to this
LANE = 128       # lane width: pad classifier output columns to this
NEG_INF = -1e30  # finite "minus infinity" for masked keys (avoids inf-inf NaNs)


# ----------------------------- kernel helpers ---------------------------------

def _layernorm(x, g, b, eps):
    mean = jnp.mean(x, axis=-1, keepdims=True)
    var = jnp.mean(jnp.square(x - mean), axis=-1, keepdims=True)
    return (x - mean) * lax.rsqrt(var + eps) * g + b


def _gelu_erf(y):
    # Exact (erf) GELU, matching HF ViT's hidden_act="gelu".
    return 0.5 * y * (1.0 + lax.erf(y * 0.7071067811865475))


# ------------------------------ Pallas kernel ----------------------------------
# One grid step == one encoder layer.  Patch embedding + sequence assembly runs
# under pl.when at step 0; final LN + pooler + classifier under pl.when at the
# last step.  The token activations live in h_ref (VMEM scratch) across steps.

def _vit_layer_kernel(
    # inputs (resident constants + per-layer weight slices)
    patches_ref, patch_w_ref, posmix_ref,
    ln1_g_ref, ln1_b_ref, wqkv_ref, bqkv_ref, wo_ref, bo_ref,
    ln2_g_ref, ln2_b_ref, w1_ref, b1_ref, w2_ref, b2_ref,
    lnf_g_ref, lnf_b_ref, pool_w_ref, pool_b_ref, clsw_ref, clsb_ref,
    # outputs
    pooled_ref, logits_ref,
    # scratch
    h_ref,
    *, B, S, S_pad, D, nH, Dh, eps):
    f32 = jnp.float32
    l = pl.program_id(0)
    n_layers = pl.num_programs(0)
    R = B * S_pad

    # ---- step 0: patch embedding + [CLS; patches; pad] + pos, one full store ----
    @pl.when(l == 0)
    def _embed():
        # CLS / pad rows of `patches` are zero, so one matmul covers everything.
        emb = jnp.dot(patches_ref[...], patch_w_ref[...],
                      preferred_element_type=f32)                   # (R, D)
        # posmix rows = [cls+pos0 ; pos+patch_b ; 0-pad], broadcast over batch.
        seq = emb.reshape(B, S_pad, D) + posmix_ref[...][None, :, :]
        h_ref[...] = seq.reshape(R, D)

    # Key-padding mask: padded key rows (>= S) contribute nothing to the softmax.
    key_ids = lax.broadcasted_iota(jnp.int32, (1, 1, S_pad), 2)
    kmask = jnp.where(key_ids < S, jnp.float32(0.0), jnp.float32(NEG_INF))

    # ----------------------- self-attention block (pre-norm) ---------------------
    h = h_ref[...]
    hn = _layernorm(h, ln1_g_ref[...], ln1_b_ref[...], eps)
    # Fused QKV projection; 1/sqrt(Dh) is pre-folded into the Q columns/bias.
    qkv = jnp.dot(hn, wqkv_ref[...], preferred_element_type=f32) + bqkv_ref[...]

    ctx_parts = []
    for hd in range(nH):
        c0 = hd * Dh
        q = qkv[:, c0:c0 + Dh].reshape(B, S_pad, Dh)
        k = qkv[:, D + c0:D + c0 + Dh].reshape(B, S_pad, Dh)
        v = qkv[:, 2 * D + c0:2 * D + c0 + Dh].reshape(B, S_pad, Dh)
        # Batched over the batch dim: one contraction per head instead of per (b, h).
        s = jnp.einsum('bqd,bkd->bqk', q, k, preferred_element_type=f32) + kmask
        m = jnp.max(s, axis=-1, keepdims=True)
        p = jnp.exp(s - m)
        p = p * pl.reciprocal(jnp.sum(p, axis=-1, keepdims=True), approx=True)
        ctx_parts.append(
            jnp.einsum('bqk,bkd->bqd', p, v,
                       preferred_element_type=f32).reshape(R, Dh))
    ctx = jnp.concatenate(ctx_parts, axis=-1)                       # (R, D), lane-dense

    attn = jnp.dot(ctx, wo_ref[...], preferred_element_type=f32) + bo_ref[...]
    h_ref[...] = h + attn                                           # residual write-back

    # ------------------------------ MLP block (pre-norm) -------------------------
    h = h_ref[...]
    hn2 = _layernorm(h, ln2_g_ref[...], ln2_b_ref[...], eps)
    mid = _gelu_erf(jnp.dot(hn2, w1_ref[...], preferred_element_type=f32)
                    + b1_ref[...])
    h_ref[...] = h + (jnp.dot(mid, w2_ref[...], preferred_element_type=f32)
                      + b2_ref[...])

    # ---------------- last step: final LN on CLS rows, pooler, classifier --------
    @pl.when(l == n_layers - 1)
    def _head():
        # Gather all CLS rows at once (LayerNorm is per-row, so applying it only
        # to the CLS rows is identical to LN over the full sequence).
        cls_tok = h_ref[...].reshape(B, S_pad, D)[:, 0, :]          # (B, D)
        cls_tok = _layernorm(cls_tok, lnf_g_ref[...], lnf_b_ref[...], eps)
        pooled = jnp.tanh(jnp.dot(cls_tok, pool_w_ref[...],
                                  preferred_element_type=f32) + pool_b_ref[...])
        pooled_ref[...] = pooled
        # Lane-dense (B, 128) classifier output; wrapper slices back to num_classes.
        logits_ref[...] = (jnp.dot(pooled, clsw_ref[...],
                                   preferred_element_type=f32) + clsb_ref[...])


# --------------------------------- wrapper --------------------------------------

def vit_lora_forward(x, params, cfg):
    """x: (B, C, H, W) float32 NCHW.  Returns (pooler_output, logits)."""
    B, C, H, W = x.shape
    p = cfg["patch"]
    D = cfg["hidden"]
    nH = cfg["heads"]
    Dh = D // nH
    I = cfg["intermediate"]
    L = cfg["layers"]
    nh, nw = H // p, W // p
    n_patches = nh * nw
    S = n_patches + 1
    S_pad = ((S + SUB - 1) // SUB) * SUB
    NC = cfg["num_classes"]
    NCp = params["cls_w_pad"].shape[-1]
    Cpp = C * p * p
    R = B * S_pad

    # im2col (flatten order (C, ph, pw) matches PyTorch Conv2d weight.view(out,-1)),
    # then lay rows out per batch as [CLS-slot(0); patches; pad(0)] so each batch's
    # token block starts on an 8-row (sublane) boundary.
    patches = x.reshape(B, C, nh, p, nw, p).transpose(0, 2, 4, 1, 3, 5)
    patches = patches.reshape(B, n_patches, Cpp)
    patches = jnp.pad(patches, ((0, 0), (1, S_pad - S), (0, 0)))
    patches = patches.reshape(R, Cpp)

    kernel = functools.partial(
        _vit_layer_kernel, B=B, S=S, S_pad=S_pad, D=D, nH=nH, Dh=Dh,
        eps=cfg["ln_eps"])

    def const(shape):
        return pl.BlockSpec(shape, lambda l: (0,) * len(shape))

    def perlayer(shape):
        return pl.BlockSpec((None,) + shape, lambda l: (l,) + (0,) * len(shape))

    in_specs = [
        const((R, Cpp)),         # patches (im2col, CLS/pad rows zero)
        const((Cpp, D)),         # patch_w
        const((S_pad, D)),       # posmix  ([cls+pos0 ; pos+patch_b ; 0])
        perlayer((1, D)),        # ln1_g
        perlayer((1, D)),        # ln1_b
        perlayer((D, 3 * D)),    # wqkv (Q columns pre-scaled by 1/sqrt(Dh))
        perlayer((1, 3 * D)),    # bqkv
        perlayer((D, D)),        # wo
        perlayer((1, D)),        # bo
        perlayer((1, D)),        # ln2_g
        perlayer((1, D)),        # ln2_b
        perlayer((D, I)),        # w1
        perlayer((1, I)),        # b1
        perlayer((I, D)),        # w2
        perlayer((1, D)),        # b2
        const((1, D)),           # lnf_g
        const((1, D)),           # lnf_b
        const((D, D)),           # pool_w
        const((1, D)),           # pool_b
        const((D, NCp)),         # cls_w (lane-padded)
        const((1, NCp)),         # cls_b (lane-padded)
    ]
    out_specs = (pl.BlockSpec((B, D), lambda l: (0, 0)),
                 pl.BlockSpec((B, NCp), lambda l: (0, 0)))

    args = (
        patches, params["patch_w"], params["posmix"],
        params["ln1_g"], params["ln1_b"], params["wqkv"], params["bqkv"],
        params["wo"], params["bo"], params["ln2_g"], params["ln2_b"],
        params["w1"], params["b1"], params["w2"], params["b2"],
        params["lnf_g"], params["lnf_b"], params["pool_w"], params["pool_b"],
        params["cls_w_pad"], params["cls_b_pad"],
    )

    pooled, logits_pad = pl.pallas_call(
        kernel,
        out_shape=(jax.ShapeDtypeStruct((B, D), jnp.float32),
                   jax.ShapeDtypeStruct((B, NCp), jnp.float32)),
        grid_spec=pltpu.PrefetchScalarGridSpec(
            num_scalar_prefetch=0,
            grid=(L,),
            in_specs=in_specs,
            out_specs=out_specs,
            scratch_shapes=[pltpu.VMEM((R, D), jnp.float32)]),  # token activations
        compiler_params=pltpu.CompilerParams(
            dimension_semantics=("arbitrary",)),                 # layers are sequential
    )(*args)

    return pooled, logits_pad[:, :NC]


# ------------------------------ parameter init ----------------------------------

def init_params(key, cfg):
    """Raw parameters in the same layout the PyTorch module would hold."""
    D = cfg["hidden"]
    C = cfg["channels"]
    p = cfg["patch"]
    I = cfg["intermediate"]
    L = cfg["layers"]
    NC = cfg["num_classes"]
    n_patches = (cfg["image_size"] // p) ** 2
    S = n_patches + 1
    std = 0.02

    def nrm(k, shape):
        return std * jax.random.normal(k, shape, dtype=jnp.float32)

    keys = iter(jax.random.split(key, 16))
    params = dict(
        patch_w=nrm(next(keys), (C * p * p, D)),
        patch_b=jnp.zeros((1, D), jnp.float32),
        cls=nrm(next(keys), (1, D)),
        pos=nrm(next(keys), (S, D)),
        # per-layer parameters, stacked over layers; q/k/v fused along columns.
        ln1_g=jnp.ones((L, 1, D), jnp.float32),
        ln1_b=jnp.zeros((L, 1, D), jnp.float32),
        wqkv=nrm(next(keys), (L, D, 3 * D)),
        bqkv=jnp.zeros((L, 1, 3 * D), jnp.float32),
        wo=nrm(next(keys), (L, D, D)),
        bo=jnp.zeros((L, 1, D), jnp.float32),
        ln2_g=jnp.ones((L, 1, D), jnp.float32),
        ln2_b=jnp.zeros((L, 1, D), jnp.float32),
        w1=nrm(next(keys), (L, D, I)),
        b1=jnp.zeros((L, 1, I), jnp.float32),
        w2=nrm(next(keys), (L, I, D)),
        b2=jnp.zeros((L, 1, D), jnp.float32),
        # final LN + pooler + classification head.
        lnf_g=jnp.ones((1, D), jnp.float32),
        lnf_b=jnp.zeros((1, D), jnp.float32),
        pool_w=nrm(next(keys), (D, D)),
        pool_b=jnp.zeros((1, D), jnp.float32),
        cls_w=nrm(next(keys), (D, NC)),
        cls_b=jnp.zeros((1, NC), jnp.float32),
    )
    return params


def preprocess_params(params, cfg):
    """One-time weight transforms (done once at load time, outside the forward):
       * fold the 1/sqrt(Dh) attention scale into the Q columns/bias of fused QKV,
       * build the additive per-token rows [cls+pos0 ; pos+patch_b ; 0-pad],
       * pad the classifier output dim to a full 128-lane tile."""
    D = cfg["hidden"]
    nH = cfg["heads"]
    Dh = D // nH
    NC = cfg["num_classes"]
    p = dict(params)

    scale = 1.0 / math.sqrt(Dh)
    p["wqkv"] = p["wqkv"].at[:, :, :D].multiply(scale)
    p["bqkv"] = p["bqkv"].at[:, :, :D].multiply(scale)

    S = p["pos"].shape[0]
    S_pad = ((S + SUB - 1) // SUB) * SUB
    row_cls = p["cls"] + p["pos"][0:1]                    # (1, D)
    rows_patch = p["pos"][1:S] + p["patch_b"]             # (S-1, D)
    p["posmix"] = jnp.concatenate(
        [row_cls, rows_patch, jnp.zeros((S_pad - S, D), jnp.float32)], axis=0)

    NCp = ((NC + LANE - 1) // LANE) * LANE
    p["cls_w_pad"] = jnp.pad(p["cls_w"], ((0, 0), (0, NCp - NC)))
    p["cls_b_pad"] = jnp.pad(p["cls_b"], ((0, 0), (0, NCp - NC)))
    return p


if __name__ == "__main__":
    key = jax.random.PRNGKey(0)
    k_params, k_x = jax.random.split(key)
    raw_params = init_params(k_params, CFG)
    params = preprocess_params(raw_params, CFG)

    B = 2
    x = jax.random.normal(
        k_x, (B, CFG["channels"], CFG["image_size"], CFG["image_size"]),
        dtype=jnp.float32)

    forward = jax.jit(lambda xx, pp: vit_lora_forward(xx, pp, CFG))
    pooled, logits = forward(x, params)
    pooled = jax.block_until_ready(pooled)
    logits = jax.block_until_ready(logits)

    assert pooled.shape == (B, CFG["hidden"])
    assert logits.shape == (B, CFG["num_classes"])
    assert bool(jnp.all(jnp.isfinite(pooled))) and bool(jnp.all(jnp.isfinite(logits)))
    print("KERNEL_OK")
</pallas_src>

<mosaic_0001>
module attributes {stable_mosaic.version = 11 : i64} {
  func.func @_vit_layer_kernel(%arg0: i32, %arg1: memref<16x192xf32, #tpu.memory_space<vmem>>, %arg2: memref<192x32xf32, #tpu.memory_space<vmem>>, %arg3: memref<8x32xf32, #tpu.memory_space<vmem>>, %arg4: memref<1x1x32xf32, #tpu.memory_space<vmem>>, %arg5: memref<1x1x32xf32, #tpu.memory_space<vmem>>, %arg6: memref<1x32x96xf32, #tpu.memory_space<vmem>>, %arg7: memref<1x1x96xf32, #tpu.memory_space<vmem>>, %arg8: memref<1x32x32xf32, #tpu.memory_space<vmem>>, %arg9: memref<1x1x32xf32, #tpu.memory_space<vmem>>, %arg10: memref<1x1x32xf32, #tpu.memory_space<vmem>>, %arg11: memref<1x1x32xf32, #tpu.memory_space<vmem>>, %arg12: memref<1x32x64xf32, #tpu.memory_space<vmem>>, %arg13: memref<1x1x64xf32, #tpu.memory_space<vmem>>, %arg14: memref<1x64x32xf32, #tpu.memory_space<vmem>>, %arg15: memref<1x1x32xf32, #tpu.memory_space<vmem>>, %arg16: memref<1x32xf32, #tpu.memory_space<vmem>>, %arg17: memref<1x32xf32, #tpu.memory_space<vmem>>, %arg18: memref<32x32xf32, #tpu.memory_space<vmem>>, %arg19: memref<1x32xf32, #tpu.memory_space<vmem>>, %arg20: memref<32x128xf32, #tpu.memory_space<vmem>>, %arg21: memref<1x128xf32, #tpu.memory_space<vmem>>, %arg22: memref<2x32xf32, #tpu.memory_space<vmem>>, %arg23: memref<2x128xf32, #tpu.memory_space<vmem>>, %arg24: memref<16x32xf32, #tpu.memory_space<vmem>>) attributes {dimension_semantics = [#tpu.dimension_semantics<arbitrary>], iteration_bounds = array<i64: 2>, scalar_prefetch = 0 : i64, scratch_operands = 1 : i64, tpu.core_type = #tpu.core_type<tc>, window_params = [{pipeline_mode = #tpu.pipeline_mode<synchronous>, transform_indices = @transform_0, window_bounds = array<i64: 16, 192>}, {pipeline_mode = #tpu.pipeline_mode<synchronous>, transform_indices = @transform_1, window_bounds = array<i64: 192, 32>}, {pipeline_mode = #tpu.pipeline_mode<synchronous>, transform_indices = @transform_2, window_bounds = array<i64: 8, 32>}, {transform_indices = @transform_3, window_bounds = array<i64: 1, 1, 32>}, {transform_indices = @transform_4, window_bounds = array<i64: 1, 1, 32>}, {transform_indices = @transform_5, window_bounds = array<i64: 1, 32, 96>}, {transform_indices = @transform_6, window_bounds = array<i64: 1, 1, 96>}, {transform_indices = @transform_7, window_bounds = array<i64: 1, 32, 32>}, {transform_indices = @transform_8, window_bounds = array<i64: 1, 1, 32>}, {transform_indices = @transform_9, window_bounds = array<i64: 1, 1, 32>}, {transform_indices = @transform_10, window_bounds = array<i64: 1, 1, 32>}, {transform_indices = @transform_11, window_bounds = array<i64: 1, 32, 64>}, {transform_indices = @transform_12, window_bounds = array<i64: 1, 1, 64>}, {transform_indices = @transform_13, window_bounds = array<i64: 1, 64, 32>}, {transform_indices = @transform_14, window_bounds = array<i64: 1, 1, 32>}, {pipeline_mode = #tpu.pipeline_mode<synchronous>, transform_indices = @transform_15, window_bounds = array<i64: 1, 32>}, {pipeline_mode = #tpu.pipeline_mode<synchronous>, transform_indices = @transform_16, window_bounds = array<i64: 1, 32>}, {pipeline_mode = #tpu.pipeline_mode<synchronous>, transform_indices = @transform_17, window_bounds = array<i64: 32, 32>}, {pipeline_mode = #tpu.pipeline_mode<synchronous>, transform_indices = @transform_18, window_bounds = array<i64: 1, 32>}, {pipeline_mode = #tpu.pipeline_mode<synchronous>, transform_indices = @transform_19, window_bounds = array<i64: 32, 128>}, {pipeline_mode = #tpu.pipeline_mode<synchronous>, transform_indices = @transform_20, window_bounds = array<i64: 1, 128>}, {pipeline_mode = #tpu.pipeline_mode<synchronous>, transform_indices = @transform_21, window_bounds = array<i64: 2, 32>}, {pipeline_mode = #tpu.pipeline_mode<synchronous>, transform_indices = @transform_22, window_bounds = array<i64: 2, 128>}]} {
    %c0_i32 = arith.constant 0 : i32
    %0 = arith.cmpi eq, %arg0, %c0_i32 : i32
    %1 = arith.extui %0 : i1 to i32
    %c0_i32_0 = arith.constant 0 : i32
    %2 = arith.cmpi ne, %1, %c0_i32_0 : i32
    scf.if %2 {
      %c0_79 = arith.constant 0 : index
      %c0_80 = arith.constant 0 : index
      %191 = vector.load %arg1[%c0_79, %c0_80] : memref<16x192xf32, #tpu.memory_space<vmem>>, vector<16x192xf32>
      %c0_81 = arith.constant 0 : index
      %c0_82 = arith.constant 0 : index
      %192 = vector.load %arg2[%c0_81, %c0_82] : memref<192x32xf32, #tpu.memory_space<vmem>>, vector<192x32xf32>
      %cst_83 = arith.constant dense<0.000000e+00> : vector<16x32xf32>
      %193 = tpu.matmul %191, %192, %cst_83 {dimension_numbers = #tpu.dot_dimension_numbers<[1], [0], [0], [1], [0, 0, 1, 1], [], []>} : vector<16x192xf32>, vector<192x32xf32>, vector<16x32xf32> -> vector<16x32xf32>
      %194 = vector.shape_cast %193 : vector<16x32xf32> to vector<2x8x32xf32>
      %c0_84 = arith.constant 0 : index
      %c0_85 = arith.constant 0 : index
      %195 = vector.load %arg3[%c0_84, %c0_85] : memref<8x32xf32, #tpu.memory_space<vmem>>, vector<8x32xf32>
      %196 = vector.shape_cast %195 : vector<8x32xf32> to vector<1x8x32xf32>
      %197 = vector.broadcast %196 : vector<1x8x32xf32> to vector<2x8x32xf32>
      %198 = arith.addf %194, %197 : vector<2x8x32xf32>
      %199 = vector.shape_cast %198 : vector<2x8x32xf32> to vector<16x32xf32>
      %c0_86 = arith.constant 0 : index
      %c0_87 = arith.constant 0 : index
      %200 = vector.load %arg24[%c0_86, %c0_87] : memref<16x32xf32, #tpu.memory_space<vmem>>, vector<16x32xf32>
      tpu.vector_store %arg24[%c0_86, %c0_87], %199 {strides = array<i32>} : memref<16x32xf32, #tpu.memory_space<vmem>>, vector<16x32xf32>,
    } else {
    }
    %3 = tpu.iota {dimensions = array<i32: 2>} : vector<1x1x8xi32>
    %c5_i32 = arith.constant 5 : i32
    %4 = vector.broadcast %c5_i32 : i32 to vector<1x1x8xi32>
    %5 = arith.cmpi slt, %3, %4 : vector<1x1x8xi32>
    %cst = arith.constant 0.000000e+00 : f32
    %cst_1 = arith.constant -1.000000e+30 : f32
    %6 = vector.broadcast %cst : f32 to vector<1x1x8xf32>
    %7 = vector.broadcast %cst_1 : f32 to vector<1x1x8xf32>
    %8 = arith.select %5, %6, %7 : vector<1x1x8xi1>, vector<1x1x8xf32>
    %c0 = arith.constant 0 : index
    %c0_2 = arith.constant 0 : index
    %9 = vector.load %arg24[%c0, %c0_2] : memref<16x32xf32, #tpu.memory_space<vmem>>, vector<16x32xf32>
    %c0_3 = arith.constant 0 : index
    %c0_4 = arith.constant 0 : index
    %c0_5 = arith.constant 0 : index
    %10 = vector.load %arg4[%c0_3, %c0_4, %c0_5] : memref<1x1x32xf32, #tpu.memory_space<vmem>>, vector<1x1x32xf32>
    %11 = vector.shape_cast %10 : vector<1x1x32xf32> to vector<1x32xf32>
    %c0_6 = arith.constant 0 : index
    %c0_7 = arith.constant 0 : index
    %c0_8 = arith.constant 0 : index
    %12 = vector.load %arg5[%c0_6, %c0_7, %c0_8] : memref<1x1x32xf32, #tpu.memory_space<vmem>>, vector<1x1x32xf32>
    %13 = vector.shape_cast %12 : vector<1x1x32xf32> to vector<1x32xf32>
    %cst_9 = arith.constant dense<0.000000e+00> : vector<16xf32>
    %14 = vector.multi_reduction <add>, %9, %cst_9 [1] : vector<16x32xf32> to vector<16xf32>
    %15 = vector.shape_cast %14 : vector<16xf32> to vector<16x1xf32>
    %cst_10 = arith.constant 3.200000e+01 : f32
    %16 = vector.broadcast %cst_10 : f32 to vector<16x1xf32>
    %17 = arith.divf %15, %16 : vector<16x1xf32>
    %18 = vector.broadcast %17 : vector<16x1xf32> to vector<16x32xf32>
    %19 = arith.subf %9, %18 : vector<16x32xf32>
    %20 = arith.mulf %19, %19 : vector<16x32xf32>
    %cst_11 = arith.constant dense<0.000000e+00> : vector<16xf32>
    %21 = vector.multi_reduction <add>, %20, %cst_11 [1] : vector<16x32xf32> to vector<16xf32>
    %22 = vector.shape_cast %21 : vector<16xf32> to vector<16x1xf32>
    %cst_12 = arith.constant 3.200000e+01 : f32
    %23 = vector.broadcast %cst_12 : f32 to vector<16x1xf32>
    %24 = arith.divf %22, %23 : vector<16x1xf32>
    %25 = vector.broadcast %17 : vector<16x1xf32> to vector<16x32xf32>
    %26 = arith.subf %9, %25 : vector<16x32xf32>
    %cst_13 = arith.constant 9.99999996E-13 : f32
    %27 = vector.broadcast %cst_13 : f32 to vector<16x1xf32>
    %28 = arith.addf %24, %27 : vector<16x1xf32>
    %29 = math.rsqrt %28 : vector<16x1xf32>
    %30 = vector.broadcast %29 : vector<16x1xf32> to vector<16x32xf32>
    %31 = arith.mulf %26, %30 : vector<16x32xf32>
    %32 = vector.broadcast %11 : vector<1x32xf32> to vector<16x32xf32>
    %33 = arith.mulf %31, %32 : vector<16x32xf32>
    %34 = vector.broadcast %13 : vector<1x32xf32> to vector<16x32xf32>
    %35 = arith.addf %33, %34 : vector<16x32xf32>
    %c0_14 = arith.constant 0 : index
    %c0_15 = arith.constant 0 : index
    %c0_16 = arith.constant 0 : index
    %36 = vector.load %arg6[%c0_14, %c0_15, %c0_16] : memref<1x32x96xf32, #tpu.memory_space<vmem>>, vector<1x32x96xf32>
    %37 = vector.shape_cast %36 : vector<1x32x96xf32> to vector<32x96xf32>
    %cst_17 = arith.constant dense<0.000000e+00> : vector<16x96xf32>
    %38 = tpu.matmul %35, %37, %cst_17 {dimension_numbers = #tpu.dot_dimension_numbers<[1], [0], [0], [1], [0, 0, 1, 1], [], []>} : vector<16x32xf32>, vector<32x96xf32>, vector<16x96xf32> -> vector<16x96xf32>
    %c0_18 = arith.constant 0 : index
    %c0_19 = arith.constant 0 : index
    %c0_20 = arith.constant 0 : index
    %39 = vector.load %arg7[%c0_18, %c0_19, %c0_20] : memref<1x1x96xf32, #tpu.memory_space<vmem>>, vector<1x1x96xf32>
    %40 = vector.shape_cast %39 : vector<1x1x96xf32> to vector<1x96xf32>
    %41 = vector.broadcast %40 : vector<1x96xf32> to vector<16x96xf32>
    %42 = arith.addf %38, %41 : vector<16x96xf32>
    %43 = vector.extract_strided_slice %42 {offsets = [0, 0], sizes = [16, 8], strides = [1, 1]} : vector<16x96xf32> to vector<16x8xf32>
    %44 = vector.shape_cast %43 : vector<16x8xf32> to vector<2x8x8xf32>
    %45 = vector.extract_strided_slice %42 {offsets = [0, 32], sizes = [16, 8], strides = [1, 1]} : vector<16x96xf32> to vector<16x8xf32>
    %46 = vector.shape_cast %45 : vector<16x8xf32> to vector<2x8x8xf32>
    %47 = vector.extract_strided_slice %42 {offsets = [0, 64], sizes = [16, 8], strides = [1, 1]} : vector<16x96xf32> to vector<16x8xf32>
    %48 = vector.shape_cast %47 : vector<16x8xf32> to vector<2x8x8xf32>
    "tpu.trace_start"() <{level = 10 : i32, message = "bqd,bkd->bqk"}> : () -> ()
    %cst_21 = arith.constant dense<0.000000e+00> : vector<2x8x8xf32>
    %49 = tpu.matmul %44, %46, %cst_21 {dimension_numbers = #tpu.dot_dimension_numbers<[2], [2], [1], [1], [0, 0, 0, 1, 1, 1], [0], [0]>} : vector<2x8x8xf32>, vector<2x8x8xf32>, vector<2x8x8xf32> -> vector<2x8x8xf32>
    "tpu.trace_stop"() : () -> ()
    %50 = vector.broadcast %8 : vector<1x1x8xf32> to vector<2x8x8xf32>
    %51 = arith.addf %49, %50 : vector<2x8x8xf32>
    %cst_22 = arith.constant dense<0xFF800000> : vector<2x8xf32>
    %52 = vector.multi_reduction <maximumf>, %51, %cst_22 [2] : vector<2x8x8xf32> to vector<2x8xf32>
    %53 = vector.shape_cast %52 : vector<2x8xf32> to vector<2x8x1xf32>
    %54 = vector.broadcast %53 : vector<2x8x1xf32> to vector<2x8x8xf32>
    %55 = arith.subf %51, %54 : vector<2x8x8xf32>
    %56 = math.exp %55 : vector<2x8x8xf32>
    %cst_23 = arith.constant dense<0.000000e+00> : vector<2x8xf32>
    %57 = vector.multi_reduction <add>, %56, %cst_23 [2] : vector<2x8x8xf32> to vector<2x8xf32>
    %58 = vector.shape_cast %57 : vector<2x8xf32> to vector<2x8x1xf32>
    %59 = tpu.reciprocal %58 {approx = true} : vector<2x8x1xf32> -> vector<2x8x1xf32>
    %60 = vector.broadcast %59 : vector<2x8x1xf32> to vector<2x8x8xf32>
    %61 = arith.mulf %56, %60 : vector<2x8x8xf32>
    "tpu.trace_start"() <{level = 10 : i32, message = "bqk,bkd->bqd"}> : () -> ()
    %cst_24 = arith.constant dense<0.000000e+00> : vector<2x8x8xf32>
    %62 = tpu.matmul %61, %48, %cst_24 {dimension_numbers = #tpu.dot_dimension_numbers<[2], [1], [1], [2], [0, 0, 0, 1, 1, 2], [0], [0]>} : vector<2x8x8xf32>, vector<2x8x8xf32>, vector<2x8x8xf32> -> vector<2x8x8xf32>
    "tpu.trace_stop"() : () -> ()
    %63 = vector.shape_cast %62 : vector<2x8x8xf32> to vector<16x8xf32>
    %64 = vector.extract_strided_slice %42 {offsets = [0, 8], sizes = [16, 8], strides = [1, 1]} : vector<16x96xf32> to vector<16x8xf32>
    %65 = vector.shape_cast %64 : vector<16x8xf32> to vector<2x8x8xf32>
    %66 = vector.extract_strided_slice %42 {offsets = [0, 40], sizes = [16, 8], strides = [1, 1]} : vector<16x96xf32> to vector<16x8xf32>
    %67 = vector.shape_cast %66 : vector<16x8xf32> to vector<2x8x8xf32>
    %68 = vector.extract_strided_slice %42 {offsets = [0, 72], sizes = [16, 8], strides = [1, 1]} : vector<16x96xf32> to vector<16x8xf32>
    %69 = vector.shape_cast %68 : vector<16x8xf32> to vector<2x8x8xf32>
    "tpu.trace_start"() <{level = 10 : i32, message = "bqd,bkd->bqk"}> : () -> ()
    %cst_25 = arith.constant dense<0.000000e+00> : vector<2x8x8xf32>
    %70 = tpu.matmul %65, %67, %cst_25 {dimension_numbers = #tpu.dot_dimension_numbers<[2], [2], [1], [1], [0, 0, 0, 1, 1, 1], [0], [0]>} : vector<2x8x8xf32>, vector<2x8x8xf32>, vector<2x8x8xf32> -> vector<2x8x8xf32>
    "tpu.trace_stop"() : () -> ()
    %71 = vector.broadcast %8 : vector<1x1x8xf32> to vector<2x8x8xf32>
    %72 = arith.addf %70, %71 : vector<2x8x8xf32>
    %cst_26 = arith.constant dense<0xFF800000> : vector<2x8xf32>
    %73 = vector.multi_reduction <maximumf>, %72, %cst_26 [2] : vector<2x8x8xf32> to vector<2x8xf32>
    %74 = vector.shape_cast %73 : vector<2x8xf32> to vector<2x8x1xf32>
    %75 = vector.broadcast %74 : vector<2x8x1xf32> to vector<2x8x8xf32>
    %76 = arith.subf %72, %75 : vector<2x8x8xf32>
    %77 = math.exp %76 : vector<2x8x8xf32>
    %cst_27 = arith.constant dense<0.000000e+00> : vector<2x8xf32>
    %78 = vector.multi_reduction <add>, %77, %cst_27 [2] : vector<2x8x8xf32> to vector<2x8xf32>
    %79 = vector.shape_cast %78 : vector<2x8xf32> to vector<2x8x1xf32>
    %80 = tpu.reciprocal %79 {approx = true} : vector<2x8x1xf32> -> vector<2x8x1xf32>
    %81 = vector.broadcast %80 : vector<2x8x1xf32> to vector<2x8x8xf32>
    %82 = arith.mulf %77, %81 : vector<2x8x8xf32>
    "tpu.trace_start"() <{level = 10 : i32, message = "bqk,bkd->bqd"}> : () -> ()
    %cst_28 = arith.constant dense<0.000000e+00> : vector<2x8x8xf32>
    %83 = tpu.matmul %82, %69, %cst_28 {dimension_numbers = #tpu.dot_dimension_numbers<[2], [1], [1], [2], [0, 0, 0, 1, 1, 2], [0], [0]>} : vector<2x8x8xf32>, vector<2x8x8xf32>, vector<2x8x8xf32> -> vector<2x8x8xf32>
    "tpu.trace_stop"() : () -> ()
    %84 = vector.shape_cast %83 : vector<2x8x8xf32> to vector<16x8xf32>
    %85 = vector.extract_strided_slice %42 {offsets = [0, 16], sizes = [16, 8], strides = [1, 1]} : vector<16x96xf32> to vector<16x8xf32>
    %86 = vector.shape_cast %85 : vector<16x8xf32> to vector<2x8x8xf32>
    %87 = vector.extract_strided_slice %42 {offsets = [0, 48], sizes = [16, 8], strides = [1, 1]} : vector<16x96xf32> to vector<16x8xf32>
    %88 = vector.shape_cast %87 : vector<16x8xf32> to vector<2x8x8xf32>
    %89 = vector.extract_strided_slice %42 {offsets = [0, 80], sizes = [16, 8], strides = [1, 1]} : vector<16x96xf32> to vector<16x8xf32>
    %90 = vector.shape_cast %89 : vector<16x8xf32> to vector<2x8x8xf32>
    "tpu.trace_start"() <{level = 10 : i32, message = "bqd,bkd->bqk"}> : () -> ()
    %cst_29 = arith.constant dense<0.000000e+00> : vector<2x8x8xf32>
    %91 = tpu.matmul %86, %88, %cst_29 {dimension_numbers = #tpu.dot_dimension_numbers<[2], [2], [1], [1], [0, 0, 0, 1, 1, 1], [0], [0]>} : vector<2x8x8xf32>, vector<2x8x8xf32>, vector<2x8x8xf32> -> vector<2x8x8xf32>
    "tpu.trace_stop"() : () -> ()
    %92 = vector.broadcast %8 : vector<1x1x8xf32> to vector<2x8x8xf32>
    %93 = arith.addf %91, %92 : vector<2x8x8xf32>
    %cst_30 = arith.constant dense<0xFF800000> : vector<2x8xf32>
    %94 = vector.multi_reduction <maximumf>, %93, %cst_30 [2] : vector<2x8x8xf32> to vector<2x8xf32>
    %95 = vector.shape_cast %94 : vector<2x8xf32> to vector<2x8x1xf32>
    %96 = vector.broadcast %95 : vector<2x8x1xf32> to vector<2x8x8xf32>
    %97 = arith.subf %93, %96 : vector<2x8x8xf32>
    %98 = math.exp %97 : vector<2x8x8xf32>
    %cst_31 = arith.constant dense<0.000000e+00> : vector<2x8xf32>
    %99 = vector.multi_reduction <add>, %98, %cst_31 [2] : vector<2x8x8xf32> to vector<2x8xf32>
    %100 = vector.shape_cast %99 : vector<2x8xf32> to vector<2x8x1xf32>
    %101 = tpu.reciprocal %100 {approx = true} : vector<2x8x1xf32> -> vector<2x8x1xf32>
    %102 = vector.broadcast %101 : vector<2x8x1xf32> to vector<2x8x8xf32>
    %103 = arith.mulf %98, %102 : vector<2x8x8xf32>
    "tpu.trace_start"() <{level = 10 : i32, message = "bqk,bkd->bqd"}> : () -> ()
    %cst_32 = arith.constant dense<0.000000e+00> : vector<2x8x8xf32>
    %104 = tpu.matmul %103, %90, %cst_32 {dimension_numbers = #tpu.dot_dimension_numbers<[2], [1], [1], [2], [0, 0, 0, 1, 1, 2], [0], [0]>} : vector<2x8x8xf32>, vector<2x8x8xf32>, vector<2x8x8xf32> -> vector<2x8x8xf32>
    "tpu.trace_stop"() : () -> ()
    %105 = vector.shape_cast %104 : vector<2x8x8xf32> to vector<16x8xf32>
    %106 = vector.extract_strided_slice %42 {offsets = [0, 24], sizes = [16, 8], strides = [1, 1]} : vector<16x96xf32> to vector<16x8xf32>
    %107 = vector.shape_cast %106 : vector<16x8xf32> to vector<2x8x8xf32>
    %108 = vector.extract_strided_slice %42 {offsets = [0, 56], sizes = [16, 8], strides = [1, 1]} : vector<16x96xf32> to vector<16x8xf32>
    %109 = vector.shape_cast %108 : vector<16x8xf32> to vector<2x8x8xf32>
    %110 = vector.extract_strided_slice %42 {offsets = [0, 88], sizes = [16, 8], strides = [1, 1]} : vector<16x96xf32> to vector<16x8xf32>
    %111 = vector.shape_cast %110 : vector<16x8xf32> to vector<2x8x8xf32>
    "tpu.trace_start"() <{level = 10 : i32, message = "bqd,bkd->bqk"}> : () -> ()
    %cst_33 = arith.constant dense<0.000000e+00> : vector<2x8x8xf32>
    %112 = tpu.matmul %107, %109, %cst_33 {dimension_numbers = #tpu.dot_dimension_numbers<[2], [2], [1], [1], [0, 0, 0, 1, 1, 1], [0], [0]>} : vector<2x8x8xf32>, vector<2x8x8xf32>, vector<2x8x8xf32> -> vector<2x8x8xf32>
    "tpu.trace_stop"() : () -> ()
    %113 = vector.broadcast %8 : vector<1x1x8xf32> to vector<2x8x8xf32>
    %114 = arith.addf %112, %113 : vector<2x8x8xf32>
    %cst_34 = arith.constant dense<0xFF800000> : vector<2x8xf32>
    %115 = vector.multi_reduction <maximumf>, %114, %cst_34 [2] : vector<2x8x8xf32> to vector<2x8xf32>
    %116 = vector.shape_cast %115 : vector<2x8xf32> to vector<2x8x1xf32>
    %117 = vector.broadcast %116 : vector<2x8x1xf32> to vector<2x8x8xf32>
    %118 = arith.subf %114, %117 : vector<2x8x8xf32>
    %119 = math.exp %118 : vector<2x8x8xf32>
    %cst_35 = arith.constant dense<0.000000e+00> : vector<2x8xf32>
    %120 = vector.multi_reduction <add>, %119, %cst_35 [2] : vector<2x8x8xf32> to vector<2x8xf32>
    %121 = vector.shape_cast %120 : vector<2x8xf32> to vector<2x8x1xf32>
    %122 = tpu.reciprocal %121 {approx = true} : vector<2x8x1xf32> -> vector<2x8x1xf32>
    %123 = vector.broadcast %122 : vector<2x8x1xf32> to vector<2x8x8xf32>
    %124 = arith.mulf %119, %123 : vector<2x8x8xf32>
    "tpu.trace_start"() <{level = 10 : i32, message = "bqk,bkd->bqd"}> : () -> ()
    %cst_36 = arith.constant dense<0.000000e+00> : vector<2x8x8xf32>
    %125 = tpu.matmul %124, %111, %cst_36 {dimension_numbers = #tpu.dot_dimension_numbers<[2], [1], [1], [2], [0, 0, 0, 1, 1, 2], [0], [0]>} : vector<2x8x8xf32>, vector<2x8x8xf32>, vector<2x8x8xf32> -> vector<2x8x8xf32>
    "tpu.trace_stop"() : () -> ()
    %126 = vector.shape_cast %125 : vector<2x8x8xf32> to vector<16x8xf32>
    %127 = tpu.concatenate %63, %84, %105, %126 in 1 : vector<16x8xf32>, vector<16x8xf32>, vector<16x8xf32>, vector<16x8xf32> -> vector<16x32xf32>
    %c0_37 = arith.constant 0 : index
    %c0_38 = arith.constant 0 : index
    %c0_39 = arith.constant 0 : index
    %128 = vector.load %arg8[%c0_37, %c0_38, %c0_39] : memref<1x32x32xf32, #tpu.memory_space<vmem>>, vector<1x32x32xf32>
    %129 = vector.shape_cast %128 : vector<1x32x32xf32> to vector<32x32xf32>
    %cst_40 = arith.constant dense<0.000000e+00> : vector<16x32xf32>
    %130 = tpu.matmul %127, %129, %cst_40 {dimension_numbers = #tpu.dot_dimension_numbers<[1], [0], [0], [1], [0, 0, 1, 1], [], []>} : vector<16x32xf32>, vector<32x32xf32>, vector<16x32xf32> -> vector<16x32xf32>
    %c0_41 = arith.constant 0 : index
    %c0_42 = arith.constant 0 : index
    %c0_43 = arith.constant 0 : index
    %131 = vector.load %arg9[%c0_41, %c0_42, %c0_43] : memref<1x1x32xf32, #tpu.memory_space<vmem>>, vector<1x1x32xf32>
    %132 = vector.shape_cast %131 : vector<1x1x32xf32> to vector<1x32xf32>
    %133 = vector.broadcast %132 : vector<1x32xf32> to vector<16x32xf32>
    %134 = arith.addf %130, %133 : vector<16x32xf32>
    %135 = arith.addf %9, %134 : vector<16x32xf32>
    %c0_44 = arith.constant 0 : index
    %c0_45 = arith.constant 0 : index
    %136 = vector.load %arg24[%c0_44, %c0_45] : memref<16x32xf32, #tpu.memory_space<vmem>>, vector<16x32xf32>
    tpu.vector_store %arg24[%c0_44, %c0_45], %135 {strides = array<i32>} : memref<16x32xf32, #tpu.memory_space<vmem>>, vector<16x32xf32>,
    %c0_46 = arith.constant 0 : index
    %c0_47 = arith.constant 0 : index
    %137 = vector.load %arg24[%c0_46, %c0_47] : memref<16x32xf32, #tpu.memory_space<vmem>>, vector<16x32xf32>
    %c0_48 = arith.constant 0 : index
    %c0_49 = arith.constant 0 : index
    %c0_50 = arith.constant 0 : index
    %138 = vector.load %arg10[%c0_48, %c0_49, %c0_50] : memref<1x1x32xf32, #tpu.memory_space<vmem>>, vector<1x1x32xf32>
    %139 = vector.shape_cast %138 : vector<1x1x32xf32> to vector<1x32xf32>
    %c0_51 = arith.constant 0 : index
    %c0_52 = arith.constant 0 : index
    %c0_53 = arith.constant 0 : index
    %140 = vector.load %arg11[%c0_51, %c0_52, %c0_53] : memref<1x1x32xf32, #tpu.memory_space<vmem>>, vector<1x1x32xf32>
    %141 = vector.shape_cast %140 : vector<1x1x32xf32> to vector<1x32xf32>
    %cst_54 = arith.constant dense<0.000000e+00> : vector<16xf32>
    %142 = vector.multi_reduction <add>, %137, %cst_54 [1] : vector<16x32xf32> to vector<16xf32>
    %143 = vector.shape_cast %142 : vector<16xf32> to vector<16x1xf32>
    %cst_55 = arith.constant 3.200000e+01 : f32
    %144 = vector.broadcast %cst_55 : f32 to vector<16x1xf32>
    %145 = arith.divf %143, %144 : vector<16x1xf32>
    %146 = vector.broadcast %145 : vector<16x1xf32> to vector<16x32xf32>
    %147 = arith.subf %137, %146 : vector<16x32xf32>
    %148 = arith.mulf %147, %147 : vector<16x32xf32>
    %cst_56 = arith.constant dense<0.000000e+00> : vector<16xf32>
    %149 = vector.multi_reduction <add>, %148, %cst_56 [1] : vector<16x32xf32> to vector<16xf32>
    %150 = vector.shape_cast %149 : vector<16xf32> to vector<16x1xf32>
    %cst_57 = arith.constant 3.200000e+01 : f32
    %151 = vector.broadcast %cst_57 : f32 to vector<16x1xf32>
    %152 = arith.divf %150, %151 : vector<16x1xf32>
    %153 = vector.broadcast %145 : vector<16x1xf32> to vector<16x32xf32>
    %154 = arith.subf %137, %153 : vector<16x32xf32>
    %cst_58 = arith.constant 9.99999996E-13 : f32
    %155 = vector.broadcast %cst_58 : f32 to vector<16x1xf32>
    %156 = arith.addf %152, %155 : vector<16x1xf32>
    %157 = math.rsqrt %156 : vector<16x1xf32>
    %158 = vector.broadcast %157 : vector<16x1xf32> to vector<16x32xf32>
    %159 = arith.mulf %154, %158 : vector<16x32xf32>
    %160 = vector.broadcast %139 : vector<1x32xf32> to vector<16x32xf32>
    %161 = arith.mulf %159, %160 : vector<16x32xf32>
    %162 = vector.broadcast %141 : vector<1x32xf32> to vector<16x32xf32>
    %163 = arith.addf %161, %162 : vector<16x32xf32>
    %c0_59 = arith.constant 0 : index
    %c0_60 = arith.constant 0 : index
    %c0_61 = arith.constant 0 : index
    %164 = vector.load %arg12[%c0_59, %c0_60, %c0_61] : memref<1x32x64xf32, #tpu.memory_space<vmem>>, vector<1x32x64xf32>
    %165 = vector.shape_cast %164 : vector<1x32x64xf32> to vector<32x64xf32>
    %cst_62 = arith.constant dense<0.000000e+00> : vector<16x64xf32>
    %166 = tpu.matmul %163, %165, %cst_62 {dimension_numbers = #tpu.dot_dimension_numbers<[1], [0], [0], [1], [0, 0, 1, 1], [], []>} : vector<16x32xf32>, vector<32x64xf32>, vector<16x64xf32> -> vector<16x64xf32>
    %c0_63 = arith.constant 0 : index
    %c0_64 = arith.constant 0 : index
    %c0_65 = arith.constant 0 : index
    %167 = vector.load %arg13[%c0_63, %c0_64, %c0_65] : memref<1x1x64xf32, #tpu.memory_space<vmem>>, vector<1x1x64xf32>
    %168 = vector.shape_cast %167 : vector<1x1x64xf32> to vector<1x64xf32>
    %169 = vector.broadcast %168 : vector<1x64xf32> to vector<16x64xf32>
    %170 = arith.addf %166, %169 : vector<16x64xf32>
    %cst_66 = arith.constant 5.000000e-01 : f32
    %171 = vector.broadcast %cst_66 : f32 to vector<16x64xf32>
    %172 = arith.mulf %171, %170 : vector<16x64xf32>
    %cst_67 = arith.constant 0.707106769 : f32
    %173 = vector.broadcast %cst_67 : f32 to vector<16x64xf32>
    %174 = arith.mulf %170, %173 : vector<16x64xf32>
    %175 = math.erf %174 : vector<16x64xf32>
    %cst_68 = arith.constant 1.000000e+00 : f32
    %176 = vector.broadcast %cst_68 : f32 to vector<16x64xf32>
    %177 = arith.addf %176, %175 : vector<16x64xf32>
    %178 = arith.mulf %172, %177 : vector<16x64xf32>
    %c0_69 = arith.constant 0 : index
    %c0_70 = arith.constant 0 : index
    %c0_71 = arith.constant 0 : index
    %179 = vector.load %arg14[%c0_69, %c0_70, %c0_71] : memref<1x64x32xf32, #tpu.memory_space<vmem>>, vector<1x64x32xf32>
    %180 = vector.shape_cast %179 : vector<1x64x32xf32> to vector<64x32xf32>
    %cst_72 = arith.constant dense<0.000000e+00> : vector<16x32xf32>
    %181 = tpu.matmul %178, %180, %cst_72 {dimension_numbers = #tpu.dot_dimension_numbers<[1], [0], [0], [1], [0, 0, 1, 1], [], []>} : vector<16x64xf32>, vector<64x32xf32>, vector<16x32xf32> -> vector<16x32xf32>
    %c0_73 = arith.constant 0 : index
    %c0_74 = arith.constant 0 : index
    %c0_75 = arith.constant 0 : index
    %182 = vector.load %arg15[%c0_73, %c0_74, %c0_75] : memref<1x1x32xf32, #tpu.memory_space<vmem>>, vector<1x1x32xf32>
    %183 = vector.shape_cast %182 : vector<1x1x32xf32> to vector<1x32xf32>
    %184 = vector.broadcast %183 : vector<1x32xf32> to vector<16x32xf32>
    %185 = arith.addf %181, %184 : vector<16x32xf32>
    %186 = arith.addf %137, %185 : vector<16x32xf32>
    %c0_76 = arith.constant 0 : index
    %c0_77 = arith.constant 0 : index
    %187 = vector.load %arg24[%c0_76, %c0_77] : memref<16x32xf32, #tpu.memory_space<vmem>>, vector<16x32xf32>
    tpu.vector_store %arg24[%c0_76, %c0_77], %186 {strides = array<i32>} : memref<16x32xf32, #tpu.memory_space<vmem>>, vector<16x32xf32>,
    %c1_i32 = arith.constant 1 : i32
    %188 = arith.cmpi eq, %arg0, %c1_i32 : i32
    %189 = arith.extui %188 : i1 to i32
    %c0_i32_78 = arith.constant 0 : i32
    %190 = arith.cmpi ne, %189, %c0_i32_78 : i32
    scf.if %190 {
      %c0_79 = arith.constant 0 : index
      %c0_80 = arith.constant 0 : index
      %191 = vector.load %arg24[%c0_79, %c0_80] : memref<16x32xf32, #tpu.memory_space<vmem>>, vector<16x32xf32>
      %192 = vector.shape_cast %191 : vector<16x32xf32> to vector<2x8x32xf32>
      %193 = vector.extract_strided_slice %192 {offsets = [0, 0, 0], sizes = [2, 1, 32], strides = [1, 1, 1]} : vector<2x8x32xf32> to vector<2x1x32xf32>
      %194 = vector.shape_cast %193 : vector<2x1x32xf32> to vector<2x32xf32>
      %c0_81 = arith.constant 0 : index
      %c0_82 = arith.constant 0 : index
      %195 = vector.load %arg16[%c0_81, %c0_82] : memref<1x32xf32, #tpu.memory_space<vmem>>, vector<1x32xf32>
      %c0_83 = arith.constant 0 : index
      %c0_84 = arith.constant 0 : index
      %196 = vector.load %arg17[%c0_83, %c0_84] : memref<1x32xf32, #tpu.memory_space<vmem>>, vector<1x32xf32>
      %cst_85 = arith.constant dense<0.000000e+00> : vector<2xf32>
      %197 = vector.multi_reduction <add>, %194, %cst_85 [1] : vector<2x32xf32> to vector<2xf32>
      %198 = vector.shape_cast %197 : vector<2xf32> to vector<2x1xf32>
      %cst_86 = arith.constant 3.200000e+01 : f32
      %199 = vector.broadcast %cst_86 : f32 to vector<2x1xf32>
      %200 = arith.divf %198, %199 : vector<2x1xf32>
      %201 = vector.broadcast %200 : vector<2x1xf32> to vector<2x32xf32>
      %202 = arith.subf %194, %201 : vector<2x32xf32>
      %203 = arith.mulf %202, %202 : vector<2x32xf32>
      %cst_87 = arith.constant dense<0.000000e+00> : vector<2xf32>
      %204 = vector.multi_reduction <add>, %203, %cst_87 [1] : vector<2x32xf32> to vector<2xf32>
      %205 = vector.shape_cast %204 : vector<2xf32> to vector<2x1xf32>
      %cst_88 = arith.constant 3.200000e+01 : f32
      %206 = vector.broadcast %cst_88 : f32 to vector<2x1xf32>
      %207 = arith.divf %205, %206 : vector<2x1xf32>
      %208 = vector.broadcast %200 : vector<2x1xf32> to vector<2x32xf32>
      %209 = arith.subf %194, %208 : vector<2x32xf32>
      %cst_89 = arith.constant 9.99999996E-13 : f32
      %210 = vector.broadcast %cst_89 : f32 to vector<2x1xf32>
      %211 = arith.addf %207, %210 : vector<2x1xf32>
      %212 = math.rsqrt %211 : vector<2x1xf32>
      %213 = vector.broadcast %212 : vector<2x1xf32> to vector<2x32xf32>
      %214 = arith.mulf %209, %213 : vector<2x32xf32>
      %215 = vector.broadcast %195 : vector<1x32xf32> to vector<2x32xf32>
      %216 = arith.mulf %214, %215 : vector<2x32xf32>
      %217 = vector.broadcast %196 : vector<1x32xf32> to vector<2x32xf32>
      %218 = arith.addf %216, %217 : vector<2x32xf32>
      %c0_90 = arith.constant 0 : index
      %c0_91 = arith.constant 0 : index
      %219 = vector.load %arg18[%c0_90, %c0_91] : memref<32x32xf32, #tpu.memory_space<vmem>>, vector<32x32xf32>
      %cst_92 = arith.constant dense<0.000000e+00> : vector<2x32xf32>
      %220 = tpu.matmul %218, %219, %cst_92 {dimension_numbers = #tpu.dot_dimension_numbers<[1], [0], [0], [1], [0, 0, 1, 1], [], []>} : vector<2x32xf32>, vector<32x32xf32>, vector<2x32xf32> -> vector<2x32xf32>
      %c0_93 = arith.constant 0 : index
      %c0_94 = arith.constant 0 : index
      %221 = vector.load %arg19[%c0_93, %c0_94] : memref<1x32xf32, #tpu.memory_space<vmem>>, vector<1x32xf32>
      %222 = vector.broadcast %221 : vector<1x32xf32> to vector<2x32xf32>
      %223 = arith.addf %220, %222 : vector<2x32xf32>
      %224 = math.tanh %223 : vector<2x32xf32>
      %c0_95 = arith.constant 0 : index
      %c0_96 = arith.constant 0 : index
      %225 = vector.load %arg22[%c0_95, %c0_96] : memref<2x32xf32, #tpu.memory_space<vmem>>, vector<2x32xf32>
      tpu.vector_store %arg22[%c0_95, %c0_96], %224 {strides = array<i32>} : memref<2x32xf32, #tpu.memory_space<vmem>>, vector<2x32xf32>,
      %c0_97 = arith.constant 0 : index
      %c0_98 = arith.constant 0 : index
      %226 = vector.load %arg20[%c0_97, %c0_98] : memref<32x128xf32, #tpu.memory_space<vmem>>, vector<32x128xf32>
      %cst_99 = arith.constant dense<0.000000e+00> : vector<2x128xf32>
      %227 = tpu.matmul %224, %226, %cst_99 {dimension_numbers = #tpu.dot_dimension_numbers<[1], [0], [0], [1], [0, 0, 1, 1], [], []>} : vector<2x32xf32>, vector<32x128xf32>, vector<2x128xf32> -> vector<2x128xf32>
      %c0_100 = arith.constant 0 : index
      %c0_101 = arith.constant 0 : index
      %228 = vector.load %arg21[%c0_100, %c0_101] : memref<1x128xf32, #tpu.memory_space<vmem>>, vector<1x128xf32>
      %229 = vector.broadcast %228 : vector<1x128xf32> to vector<2x128xf32>
      %230 = arith.addf %227, %229 : vector<2x128xf32>
      %c0_102 = arith.constant 0 : index
      %c0_103 = arith.constant 0 : index
      %231 = vector.load %arg23[%c0_102, %c0_103] : memref<2x128xf32, #tpu.memory_space<vmem>>, vector<2x128xf32>
      tpu.vector_store %arg23[%c0_102, %c0_103], %230 {strides = array<i32>} : memref<2x128xf32, #tpu.memory_space<vmem>>, vector<2x128xf32>,
    } else {
    }
    return
  }
  func.func @transform_0(%arg0: i32) -> (i32, i32) {
    %c0_i32 = arith.constant 0 : i32
    %c0_i32_0 = arith.constant 0 : i32
    %c0_i32_1 = arith.constant 0 : i32
    return %c0_i32, %c0_i32_0 : i32, i32
  }
  func.func @transform_1(%arg0: i32) -> (i32, i32) {
    %c0_i32 = arith.constant 0 : i32
    %c0_i32_0 = arith.constant 0 : i32
    %c0_i32_1 = arith.constant 0 : i32
    return %c0_i32, %c0_i32_0 : i32, i32
  }
  func.func @transform_2(%arg0: i32) -> (i32, i32) {
    %c0_i32 = arith.constant 0 : i32
    %c0_i32_0 = arith.constant 0 : i32
    %c0_i32_1 = arith.constant 0 : i32
    return %c0_i32, %c0_i32_0 : i32, i32
  }
  func.func @transform_3(%arg0: i32) -> (i32, i32, i32) {
    %c0_i32 = arith.constant 0 : i32
    %c0_i32_0 = arith.constant 0 : i32
    %c0_i32_1 = arith.constant 0 : i32
    return %arg0, %c0_i32, %c0_i32_0 : i32, i32, i32
  }
  func.func @transform_4(%arg0: i32) -> (i32, i32, i32) {
    %c0_i32 = arith.constant 0 : i32
    %c0_i32_0 = arith.constant 0 : i32
    %c0_i32_1 = arith.constant 0 : i32
    return %arg0, %c0_i32, %c0_i32_0 : i32, i32, i32
  }
  func.func @transform_5(%arg0: i32) -> (i32, i32, i32) {
    %c0_i32 = arith.constant 0 : i32
    %c0_i32_0 = arith.constant 0 : i32
    %c0_i32_1 = arith.constant 0 : i32
    return %arg0, %c0_i32, %c0_i32_0 : i32, i32, i32
  }
  func.func @transform_6(%arg0: i32) -> (i32, i32, i32) {
    %c0_i32 = arith.constant 0 : i32
    %c0_i32_0 = arith.constant 0 : i32
    %c0_i32_1 = arith.constant 0 : i32
    return %arg0, %c0_i32, %c0_i32_0 : i32, i32, i32
  }
  func.func @transform_7(%arg0: i32) -> (i32, i32, i32) {
    %c0_i32 = arith.constant 0 : i32
    %c0_i32_0 = arith.constant 0 : i32
    %c0_i32_1 = arith.constant 0 : i32
    return %arg0, %c0_i32, %c0_i32_0 : i32, i32, i32
  }
  func.func @transform_8(%arg0: i32) -> (i32, i32, i32) {
    %c0_i32 = arith.constant 0 : i32
    %c0_i32_0 = arith.constant 0 : i32
    %c0_i32_1 = arith.constant 0 : i32
    return %arg0, %c0_i32, %c0_i32_0 : i32, i32, i32
  }
  func.func @transform_9(%arg0: i32) -> (i32, i32, i32) {
    %c0_i32 = arith.constant 0 : i32
    %c0_i32_0 = arith.constant 0 : i32
    %c0_i32_1 = arith.constant 0 : i32
    return %arg0, %c0_i32, %c0_i32_0 : i32, i32, i32
  }
  func.func @transform_10(%arg0: i32) -> (i32, i32, i32) {
    %c0_i32 = arith.constant 0 : i32
    %c0_i32_0 = arith.constant 0 : i32
    %c0_i32_1 = arith.constant 0 : i32
    return %arg0, %c0_i32, %c0_i32_0 : i32, i32, i32
  }
  func.func @transform_11(%arg0: i32) -> (i32, i32, i32) {
    %c0_i32 = arith.constant 0 : i32
    %c0_i32_0 = arith.constant 0 : i32
    %c0_i32_1 = arith.constant 0 : i32
    return %arg0, %c0_i32, %c0_i32_0 : i32, i32, i32
  }
  func.func @transform_12(%arg0: i32) -> (i32, i32, i32) {
    %c0_i32 = arith.constant 0 : i32
    %c0_i32_0 = arith.constant 0 : i32
    %c0_i32_1 = arith.constant 0 : i32
    return %arg0, %c0_i32, %c0_i32_0 : i32, i32, i32
  }
  func.func @transform_13(%arg0: i32) -> (i32, i32, i32) {
    %c0_i32 = arith.constant 0 : i32
    %c0_i32_0 = arith.constant 0 : i32
    %c0_i32_1 = arith.constant 0 : i32
    return %arg0, %c0_i32, %c0_i32_0 : i32, i32, i32
  }
  func.func @transform_14(%arg0: i32) -> (i32, i32, i32) {
    %c0_i32 = arith.constant 0 : i32
    %c0_i32_0 = arith.constant 0 : i32
    %c0_i32_1 = arith.constant 0 : i32
    return %arg0, %c0_i32, %c0_i32_0 : i32, i32, i32
  }
  func.func @transform_15(%arg0: i32) -> (i32, i32) {
    %c0_i32 = arith.constant 0 : i32
    %c0_i32_0 = arith.constant 0 : i32
    %c0_i32_1 = arith.constant 0 : i32
    return %c0_i32, %c0_i32_0 : i32, i32
  }
  func.func @transform_16(%arg0: i32) -> (i32, i32) {
    %c0_i32 = arith.constant 0 : i32
    %c0_i32_0 = arith.constant 0 : i32
    %c0_i32_1 = arith.constant 0 : i32
    return %c0_i32, %c0_i32_0 : i32, i32
  }
  func.func @transform_17(%arg0: i32) -> (i32, i32) {
    %c0_i32 = arith.constant 0 : i32
    %c0_i32_0 = arith.constant 0 : i32
    %c0_i32_1 = arith.constant 0 : i32
    return %c0_i32, %c0_i32_0 : i32, i32
  }
  func.func @transform_18(%arg0: i32) -> (i32, i32) {
    %c0_i32 = arith.constant 0 : i32
    %c0_i32_0 = arith.constant 0 : i32
    %c0_i32_1 = arith.constant 0 : i32
    return %c0_i32, %c0_i32_0 : i32, i32
  }
  func.func @transform_19(%arg0: i32) -> (i32, i32) {
    %c0_i32 = arith.constant 0 : i32
    %c0_i32_0 = arith.constant 0 : i32
    %c0_i32_1 = arith.constant 0 : i32
    return %c0_i32, %c0_i32_0 : i32, i32
  }
  func.func @transform_20(%arg0: i32) -> (i32, i32) {
    %c0_i32 = arith.constant 0 : i32
    %c0_i32_0 = arith.constant 0 : i32
    %c0_i32_1 = arith.constant 0 : i32
    return %c0_i32, %c0_i32_0 : i32, i32
  }
  func.func @transform_21(%arg0: i32) -> (i32, i32) {
    %c0_i32 = arith.constant 0 : i32
    %c0_i32_0 = arith.constant 0 : i32
    %c0_i32_1 = arith.constant 0 : i32
    return %c0_i32, %c0_i32_0 : i32, i32
  }
  func.func @transform_22(%arg0: i32) -> (i32, i32) {
    %c0_i32 = arith.constant 0 : i32
    %c0_i32_0 = arith.constant 0 : i32
    %c0_i32_1 = arith.constant 0 : i32
    return %c0_i32, %c0_i32_0 : i32, i32
  }
}

</mosaic_0001>

<bundles_post_ra>
// kernel: _lambda_.1
= control target key start
LH: loop header
LB: loop body
LE: loop exit
PB: predicated region body
PF: predicated region fallthrough
CT: control target
= control target key end

     0   :  { %s3005_s0 = inlined_call_operand.vmem [shape: f32[16,192], index: 0, kind: input, shape index: {}]   ;;  %s3006_s1 = inlined_call_operand.vmem [shape: f32[192,32], index: 1, kind: input, shape index: {}]   ;;  %s3007_s2 = inlined_call_operand.vmem [shape: f32[8,32], index: 2, kind: input, shape index: {}]   ;;  %s3008_s3 = inlined_call_operand.vmem [shape: f32[2,1,32], index: 3, kind: input, shape index: {}]   ;;  %s3009_s4 = inlined_call_operand.vmem [shape: f32[2,1,32], index: 4, kind: input, shape index: {}]   ;;  %s3010_s5 = inlined_call_operand.vmem [shape: f32[2,32,96], index: 5, kind: input, shape index: {}]   ;;  %s3011_s6 = inlined_call_operand.vmem [shape: f32[2,1,96], index: 6, kind: input, shape index: {}]   ;;  %s3012_s7 = inlined_call_operand.vmem [shape: f32[2,32,32], index: 7, kind: input, shape index: {}]   ;;  %s3013_s8 = inlined_call_operand.vmem [shape: f32[2,1,32], index: 8, kind: input, shape index: {}]   ;;  %s3014_s9 = inlined_call_operand.vmem [shape: f32[2,1,32], index: 9, kind: input, shape index: {}]   ;;  %s3015_s10 = inlined_call_operand.vmem [shape: f32[2,1,32], index: 10, kind: input, shape index: {}]   ;;  %s3016_s11 = inlined_call_operand.vmem [shape: f32[2,32,64], index: 11, kind: input, shape index: {}]   ;;  %s3017_s12 = inlined_call_operand.vmem [shape: f32[2,1,64], index: 12, kind: input, shape index: {}]   ;;  %s3018_s13 = inlined_call_operand.vmem [shape: f32[2,64,32], index: 13, kind: input, shape index: {}]   ;;  %s3019_s14 = inlined_call_operand.vmem [shape: f32[2,1,32], index: 14, kind: input, shape index: {}]   ;;  %s3020_s15 = inlined_call_operand.vmem [shape: f32[1,32], index: 15, kind: input, shape index: {}]   ;;  %s3021_s16 = inlined_call_operand.vmem [shape: f32[1,32], index: 16, kind: input, shape index: {}]   ;;  %s3022_s17 = inlined_call_operand.vmem [shape: f32[32,32], index: 17, kind: input, shape index: {}]   ;;  %s3023_s18 = inlined_call_operand.vmem [shape: f32[1,32], index: 18, kind: input, shape index: {}]   ;;  %s3024_s19 = inlined_call_operand.vmem [shape: f32[32,128], index: 19, kind: input, shape index: {}]   ;;  %s3025_s20 = inlined_call_operand.vmem [shape: f32[1,128], index: 20, kind: input, shape index: {}]   ;;  %s3026_s21 = inlined_call_operand.hbm [shape: f32[2,32], index: 21, kind: output, shape index: {0}]   ;;  %s3027_s22 = inlined_call_operand.hbm [shape: f32[2,128], index: 22, kind: output, shape index: {1}]  }
   0x1   :  { %3032 = sst [smem:[#allocation10_spill]] %s3005_s0 }
   0x2   :  { %3033 = sst [smem:[#allocation11_spill]] %s3006_s1 }
   0x3   :  { %3034 = sst [smem:[#allocation12_spill]] %s3007_s2 }
   0x4   :  { %3035 = sst [smem:[#allocation13_spill]] %s3008_s3 }
   0x5   :  { %3036 = sst [smem:[#allocation14_spill]] %s3009_s4 }
   0x6   :  { %3037 = sst [smem:[#allocation15_spill]] %s3010_s5 }
   0x7   :  { %3038 = sst [smem:[#allocation16_spill]] %s3011_s6 }
   0x8   :  { %3039 = sst [smem:[#allocation17_spill]] %s3012_s7 }
   0x9   :  { %3040 = sst [smem:[#allocation18_spill]] %s3023_s18 }
   0xa   :  { %3041 = sst [smem:[#allocation19_spill]] %s3024_s19 }
   0xb   :  { %3042 = sst [smem:[#allocation20_spill]] %s3025_s20 }
   0xc   :  { %3043 = sst [smem:[#allocation21_spill]] %s3026_s21 }
   0xd   :  { %3044 = sst [smem:[#allocation22_spill]] %s3027_s22 }
   0xe   :  { %28 = vsyncpa [#allocation4], 0 }
   0xf   :  { %29 = vsyncpa [#allocation6], 0  ;;  %s2559_s3 = smov 0  }
  0x10 LB: > { %3045 = sst [smem:[#allocation9_spill]] %s2424_s3  ;;  %s2565_s28 = sadd.s32 4294967295, %s2424_s3   ;;  %s2424_s3 = sphi %s2559_s3, %s35_s3  }
  0x11   : > { %p2174_p0 = scmp.ge.s32.totalorder %s2424_s3, 1  ;;  %p701_p1 = scmp.lt.s32.totalorder %s2424_s3, 3 }
  0x13   : > { %p702_p2 = pnand %p2174_p0, %p701_p1 }
  0x14   : > { %p797_p3 = scmp.lt.s32.totalorder (!%p702_p2), %s2565_s28, 1  ;;  %s3049_s22 = sld [smem:[#allocation15_spill]] (!%p702_p2) }
  0x15   : > { %705 = sbr.rel (%p702_p2) target bundleno = 3098 (0xc1a), region = 104  ;;  %s3050_s7 = sld [smem:[#allocation17_spill]] (!%p702_p2) }
  0x16   : > { %p2183_p4 = scmp.ne.s32.totalorder (!%p702_p2), %s2565_s28, 0 }
  0x1a   : > { %s2571_s29 = scalar_select %p797_p3, %s2565_s28, 1 }
  0x1b   : > { %s3051_s30 = sld [smem:[#allocation11_spill]] (!%p2183_p4) }
  0x1c   : > { %s2229_s25 = sshll.u32 %s2571_s29, 5  ;;  %s821_s6 = scalar_lea.vmem %s3014_s9, %s2571_s29 }
  0x1d   : > { %s2589_s21 = scalar_lea.vmem %s3049_s22, %s2229_s25  ;;  %s2594_s19 = scalar_lea.vmem %s3050_s7, %s2229_s25 }
  0x1e   : > { %s824_s27 = scalar_lea.vmem %s3015_s10, %s2571_s29  ;;  %s2611_s4 = scalar_lea.vmem %s3016_s11, %s2229_s25 }
  0x1f   : > { %s832_s3 = scalar_lea.vmem %s3017_s12, %s2571_s29  ;;  %s2232_s7 = sshll.u32 %s2571_s29, 6 }
  0x20   : > { %s2621_s1 = scalar_lea.vmem %s3018_s13, %s2232_s7  ;;  %s840_s26 = scalar_lea.vmem %s3019_s14, %s2571_s29 }
  0x21   : > { %844 = sbr.rel (%p2183_p4) target bundleno = 207 (0xcf), region = 108  ;;  %s3052_s5 = sld [smem:[#allocation10_spill]] (!%p2183_p4) }
  0x22   : > { %s3053_s25 = sld [smem:[#allocation12_spill]] (!%p2183_p4) }
  0x26   : > { %v864_v0 = vld [vmem:[%s3051_s30 + $0x78] sm:$0xff]  ;;  %v863_v1 = vld [vmem:[%s3051_s30 + $0x70] sm:$0xff]  ;;  %v862_v2 = vld [vmem:[%s3051_s30 + $0x68] sm:$0xff]  ;;  %vm873_vm0 = vcmask 523264   ;;  %vm929_vm1 = vcmask 261120  }
  0x27   : > { %880 = vmatpush.msra.mxu0 %v864_v0  ;;  %2233 = vmatpush.msra.mxu2 %v864_v0  ;;  %v872_v3 = vld [vmem:[%s3051_s30 + $0xb8] sm:$0xff]  ;;  %v871_v4 = vld [vmem:[%s3051_s30 + $0xb0] sm:$0xff]  ;;  %v861_v5 = vld [vmem:[%s3051_s30 + $0x60] sm:$0xff] }
  0x28   : > { %911 = vmatpush.msra.mxu1 %v872_v3  ;;  %v870_v6 = vld [vmem:[%s3051_s30 + $0xa8] sm:$0xff]  ;;  %v860_v7 = vld [vmem:[%s3051_s30 + $0x58] sm:$0xff]  ;;  %v869_v8 = vld [vmem:[%s3051_s30 + $0xa0] sm:$0xff] }
  0x29   : > { %881 = vmatpush.msra.mxu0 %v863_v1  ;;  %2234 = vmatpush.msra.mxu2 %v863_v1  ;;  %v859_v9 = vld [vmem:[%s3051_s30 + $0x50] sm:$0xff]  ;;  %v868_v10 = vld [vmem:[%s3051_s30 + $0x98] sm:$0xff]  ;;  %v858_v11 = vld [vmem:[%s3051_s30 + $0x48] sm:$0xff] }
  0x2a   : > { %912 = vmatpush.msra.mxu1 %v871_v4  ;;  %v867_v12 = vld [vmem:[%s3051_s30 + $0x90] sm:$0xff]  ;;  %v857_v13 = vld [vmem:[%s3051_s30 + $0x40] sm:$0xff]  ;;  %v866_v14 = vld [vmem:[%s3051_s30 + $0x88] sm:$0xff] }
  0x2b   : > { %882 = vmatpush.msra.mxu0 %v862_v2  ;;  %2235 = vmatpush.msra.mxu2 %v862_v2  ;;  %v856_v15 = vld [vmem:[%s3051_s30 + $0x38] sm:$0xff]  ;;  %v865_v16 = vld [vmem:[%s3051_s30 + $0x80] sm:$0xff]  ;;  %v855_v17 = vld [vmem:[%s3051_s30 + $0x30] sm:$0xff] }
  0x2c   : > { %913 = vmatpush.msra.mxu1 %v870_v6  ;;  %v846_v18 = vld [vmem:[%s3052_s5 + $0x8] sm:$0xff]  ;;  %v853_v20 = vld [vmem:[%s3051_s30 + $0x20] sm:$0xff]  ;;  %v852_v21 = vld [vmem:[%s3051_s30 + $0x18] sm:$0xff] }
  0x2d   : > { %883 = vmatpush.msra.mxu0 %v861_v5  ;;  %2236 = vmatpush.msra.mxu2 %v861_v5  ;;  %v854_v19 = vld [vmem:[%s3051_s30 + $0x28] sm:$0xff]  ;;  %v851_v22 = vld [vmem:[%s3051_s30 + $0x10] sm:$0xff]  ;;  %v848_v23 = vld [vmem:[%s3052_s5 + $0x18] sm:$0xff] }
  0x2e   : > { %914 = vmatpush.msra.mxu1 %v869_v8  ;;  %v850_v24 = vld [vmem:[%s3051_s30 + $0x8] sm:$0xff]  ;;  %v849_v25 = vld [vmem:[%s3051_s30] sm:$0xff]  ;;  %v847_v27 = vld [vmem:[%s3052_s5 + $0x10] sm:$0xff] }
  0x2f   : > { %884 = vmatpush.msra.mxu0 %v860_v7  ;;  %2237 = vmatpush.msra.mxu2 %v860_v7  ;;  %v845_v26 = vld [vmem:[%s3052_s5] sm:$0xff] }
  0x30   : > { %915 = vmatpush.msra.mxu1 %v868_v10  ;;  %v926_v30 = vld [vmem:[%s3053_s25] sm:$0xff] }
  0x31   : > { %885 = vmatpush.msra.mxu0 %v859_v9  ;;  %2238 = vmatpush.msra.mxu2 %v859_v9 }
  0x32   : > { %916 = vmatpush.msra.mxu1 %v867_v12 }
  0x33   : > { %886 = vmatpush.msra.mxu0 %v858_v11  ;;  %2239 = vmatpush.msra.mxu2 %v858_v11 }
  0x34   : > { %917 = vmatpush.msra.mxu1 %v866_v14 }
  0x35   : > { %887 = vmatpush.msra.mxu0 %v857_v13  ;;  %2240 = vmatpush.msra.mxu2 %v857_v13 }
  0x36   : > { %918 = vmatpush.msra.mxu1 %v865_v16 }
  0x37   : > { %888 = vmatpush.msra.mxu0 %v856_v15  ;;  %2241 = vmatpush.msra.mxu2 %v856_v15 }
  0x38   : > { %2184 = vmatmul.msk.f32.vlgmr.msra.gmra.mxu1 %vm873_vm0, %v846_v18 }
  0x39   : > { %889 = vmatpush.msra.mxu0 %v855_v17  ;;  %2242 = vmatpush.msra.mxu2 %v855_v17 }
  0x3b   : > { %890 = vmatpush.msra.mxu0 %v854_v19  ;;  %2243 = vmatpush.msra.mxu2 %v854_v19 }
  0x3d   : > { %891 = vmatpush.msra.mxu0 %v853_v20  ;;  %2244 = vmatpush.msra.mxu2 %v853_v20 }
  0x3f   : > { %892 = vmatpush.msra.mxu0 %v852_v21  ;;  %2245 = vmatpush.msra.mxu2 %v852_v21 }
  0x40   : > { %2185 = vmatmul.msk.f32.gmra.mxu1 %vm873_vm0, %v848_v23 }
  0x41   : > { %893 = vmatpush.msra.mxu0 %v851_v22  ;;  %2246 = vmatpush.msra.mxu2 %v851_v22 }
  0x43   : > { %894 = vmatpush.msra.mxu0 %v850_v24  ;;  %2247 = vmatpush.msra.mxu2 %v850_v24 }
  0x45   : > { %895 = vmatpush.msra.mxu0 %v849_v25  ;;  %2248 = vmatpush.msra.mxu2 %v849_v25 }
  0x46   : > { %896 = vmatmul.f32.vlgmr.msra.gmra.mxu0 %v845_v26  ;;  %899 = vmatmul.f32.vlgmr.msra.gmra.mxu2 %v847_v27 }
  0xb5   : > { %v920_v28 = vpop.f32.mrf.mxu1 }
  0xbd   : > { %v923_v33 = vpop.f32.mrf.mxu1 }
  0xc3   : > { %v897_v29 = vpop.f32.mrf.mxu0 }
  0xc4   : > { %v921_v31 = vadd.f32 %v920_v28, %v897_v29 }
  0xc6   : > { %v927_v32 = vadd.f32 %v926_v30, %v921_v31 }
  0xc8   : > { %930 = vst.msk [vmem:[#allocation2] sm:$0xff] %vm929_vm1, %v927_v32 }
  0xc9   : > { %v900_v34 = vpop.f32.mrf.mxu2 }
  0xca   : > { %v924_v35 = vadd.f32 %v923_v33, %v900_v34 }
  0xcc   : > { %v928_v36 = vadd.f32 %v926_v30, %v924_v35 }
  0xce   : > { %931 = vst.msk [vmem:[#allocation2 + $0x8] sm:$0xff] %vm929_vm1, %v928_v36 }
  0xcf PF: > { %v2717_v37 = vld [vmem:[#allocation2] sm:$0xff]  ;;  %vm940_vm2 = vcmask 261120   ;;  %v2426_v41 = vmov 32.0   ;;  %v1005_v58 = vld [vmem:[%s2589_s21 + $0x18] sm:$0xff]  ;;  %v1004_v59 = vld [vmem:[%s2589_s21 + $0x10] sm:$0xff]  ;;  %s3054_s18 = sld [smem:[#allocation13_spill]]  ;;  %v932_v35 = vlaneseq }
  0xd0   : > { %v941_v39 = vsel %vm940_vm2, %v2717_v37, 0.0  ;;  %2300 = vrcp.f32 %v2426_v41  ;;  %1028 = vmatpush.msra.mxu0 %v1005_v58  ;;  %v1003_v60 = vld [vmem:[%s2589_s21 + $0x8] sm:$0xff]  ;;  %v1002_v61 = vld [vmem:[%s2589_s21] sm:$0xff]  ;;  %s3056_s0 = sld [smem:[#allocation14_spill]]  ;;  %s2429_s7 = smov 80   ;;  %vm1042_vm10 = vcmask 64512  }
  0xd1   : > { %942 = vadd.xlane.f32.xlu0 %v941_v39  ;;  %s3058_s21 = sld [smem:[#allocation16_spill]]  ;;  %s2430_s23 = smov 88   ;;  %v933_v36 = vand.u32 127, %v932_v35  ;;  %v2434_v39 = vmov -1e+30   ;;  %vm1584_vm12 = vcmask 130048  }
  0xd2   : > { %1029 = vmatpush.msra.mxu0 %v1004_v59  ;;  %s2433_s2 = smov 104   ;;  %s2435_s25 = smov 120   ;;  %vm1587_vm13 = vcmask 195584  }
  0xd3   : > { %vm934_vm11 = vcmp.lt.s32.totalorder %v933_v36, 5  ;;  %p2220_p5 = scmp.ne.s32.totalorder %s2565_s28, 1 }
  0xd4   : > { %1030 = vmatpush.msra.mxu0 %v1003_v60 }
  0xd5   : > { %v2719_v38 = vld [vmem:[#allocation2 + $0x8] sm:$0xff]  ;;  %s3055_s20 = scalar_lea.vmem %s3054_s18, %s2571_s29  ;;  %s2427_s18 = smov 64  }
  0xd6   : > { %v944_v40 = vsel %vm940_vm2, %v2719_v38, 0.0  ;;  %v2301_v42 = vpop.eup %2300  ;;  %1031 = vmatpush.msra.mxu0 %v1002_v61  ;;  %v2292_v16 = vld [vmem:[%s3055_s20] ss:$0 sm:$0xff]  ;;  %s3057_s24 = scalar_lea.vmem %s3056_s0, %s2571_s29  ;;  %s2428_s20 = smov 96  }
  0xd7   : > { %945 = vadd.xlane.f32.xlu1 %v944_v40  ;;  %v948_v43 = vmul.f32 32.0, %v2301_v42  ;;  %vm952_vm3 = vweird.f32 %v2301_v42  ;;  %v2293_v20 = vld [vmem:[%s3057_s24] ss:$0 sm:$0xff]  ;;  %s3059_s22 = scalar_lea.vmem %s3058_s21, %s2571_s29  ;;  %s2431_s0 = smov 72   ;;  %v2777_v40 = vsel %vm934_vm11, 0.0, %v2434_v39 }
  0xd8   : > { %v2294_v26 = vld [vmem:[%s3059_s22] ss:$0 sm:$0xff]  ;;  %s2432_s24 = smov 112   ;;  %s2436_s21 = smov 48  }
  0xd9   : > { %v949_v44 = vsub.f32 1.0, %v948_v43  ;;  %s2437_s22 = smov 40  }
  0xdb   : > { %v950_v45 = vmul.f32 %v2301_v42, %v949_v44 }
  0xdd   : > { %v951_v46 = vadd.f32 %v2301_v42, %v950_v45 }
  0xdf   : > { %v2725_v47 = vsel %vm952_vm3, %v2301_v42, %v951_v46 }
 0x144   : > { %v943_v48 = vpop.xlane.xlu0 %942 }
 0x145   : > { %v954_v50 = vmul.f32 %v2725_v47, %v943_v48 }
 0x147   : > { %v956_v52 = vsub.f32 %v2717_v37, %v954_v50 }
 0x149   : > { %v958_v54 = vmul.f32 %v956_v52, %v956_v52 }
 0x14a   : > { %v946_v49 = vpop.xlane.xlu1 %945 }
 0x14b   : > { %v955_v51 = vmul.f32 %v2725_v47, %v946_v49  ;;  %v960_v56 = vsel %vm940_vm2, %v958_v54, 0.0 }
 0x14c   : > { %961 = vadd.xlane.f32.xlu0 %v960_v56 }
 0x14d   : > { %v957_v53 = vsub.f32 %v2719_v38, %v955_v51 }
 0x14f   : > { %v959_v55 = vmul.f32 %v957_v53, %v957_v53 }
 0x151   : > { %v963_v57 = vsel %vm940_vm2, %v959_v55, 0.0 }
 0x152   : > { %964 = vadd.xlane.f32.xlu2 %v963_v57 }
 0x1bf   : > { %v962_v62 = vpop.xlane.xlu0 %961 }
 0x1c0   : > { %v966_v0 = vmul.f32 %v962_v62, %v2725_v47 }
 0x1c2   : > { %v968_v2 = vadd.f32 1e-12, %v966_v0 }
 0x1c4   : > { %2302 = vrsqrt.f32 %v968_v2  ;;  %vm976_vm7 = vweird.f32 %v968_v2 }
 0x1c5   : > { %v965_v63 = vpop.xlane.xlu2 %964 }
 0x1c6   : > { %v967_v1 = vmul.f32 %v965_v63, %v2725_v47 }
 0x1c8   : > { %v969_v3 = vadd.f32 1e-12, %v967_v1 }
 0x1ca   : > { %2304 = vrsqrt.f32 %v969_v3  ;;  %v2303_v4 = vpop.eup %2302  ;;  %vm986_vm4 = vweird.f32 %v969_v3 }
 0x1cb   : > { %v971_v6 = vmul.f32 %v2303_v4, %v968_v2  ;;  %vm977_vm6 = vweird.f32 %v2303_v4 }
 0x1cc   : > { %vm978_vm9 = vmor %vm976_vm7, %vm977_vm6 }
 0x1cd   : > { %v972_v8 = vmul.f32 %v2303_v4, %v971_v6 }
 0x1cf   : > { %v973_v10 = vmul.f32 0.5, %v972_v8 }
 0x1d0   : > { %v2305_v5 = vpop.eup %2304 }
 0x1d1   : > { %v981_v7 = vmul.f32 %v2305_v5, %v969_v3  ;;  %vm987_vm5 = vweird.f32 %v2305_v5  ;;  %v974_v12 = vsub.f32 1.5, %v973_v10 }
 0x1d2   : > { %vm988_vm8 = vmor %vm986_vm4, %vm987_vm5 }
 0x1d3   : > { %v982_v9 = vmul.f32 %v2305_v5, %v981_v7  ;;  %v975_v14 = vmul.f32 %v2303_v4, %v974_v12 }
 0x1d5   : > { %v983_v11 = vmul.f32 0.5, %v982_v9  ;;  %v979_v17 = vsel %vm978_vm9, %v2303_v4, %v975_v14  ;;  %vm1826_vm9 = vcmask 523264  }
 0x1d6   : > { %v990_v19 = vmul.f32 %v979_v17, %v956_v52 }
 0x1d7   : > { %v984_v13 = vsub.f32 1.5, %v983_v11 }
 0x1d8   : > { %v995_v21 = vmul.f32 %v2292_v16, %v990_v19 }
 0x1d9   : > { %v985_v15 = vmul.f32 %v2305_v5, %v984_v13 }
 0x1da   : > { %v1000_v23 = vadd.f32 %v2293_v20, %v995_v21 }
 0x1db   : > { %v989_v18 = vsel %vm988_vm8, %v2305_v5, %v985_v15 }
 0x1dc   : > { %v991_v22 = vmul.f32 %v989_v18, %v957_v53  ;;  %2186 = vmatmul.msk.f32.vlgmr.msra.gmra.mxu0 %vm940_vm2, %v1000_v23 }
 0x1de   : > { %v996_v24 = vmul.f32 %v2292_v16, %v991_v22 }
 0x1e0   : > { %v1001_v25 = vadd.f32 %v2293_v20, %v996_v24 }
 0x1e4   : > { %2187 = vmatmul.msk.f32.gmra.mxu0 %vm940_vm2, %v1001_v25 }
 0x259   : > { %v1033_v27 = vpop.f32.mrf.mxu0 }
 0x25a   : > { %v2756_v28 = vadd.f32 %v2294_v26, %v1033_v27 }
 0x25c   : > { %1116 = vrot.lane.b32.xlu0 %v2756_v28, %s2427_s18  ;;  %1040 = vrot.lane.b32.xlu1 %v2756_v28, %s2428_s20 }
 0x261   : > { %v1036_v29 = vpop.f32.mrf.mxu0 }
 0x262   : > { %v2762_v30 = vadd.f32 %v2294_v26, %v1036_v29 }
 0x264   : > { %1300 = vrot.lane.b32.xlu0 %v2756_v28, %s2429_s7  ;;  %1198 = vrot.lane.b32.xlu1 %v2762_v30, %s2430_s23 }
 0x26c   : > { %1430 = vrot.lane.b32.xlu0 %v2756_v28, %s2431_s0  ;;  %1170 = vrot.lane.b32.xlu1 %v2756_v28, %s2430_s23  ;;  %s2441_s23 = smov 24  }
 0x274   : > { %1298 = vrot.lane.b32.xlu1 %v2756_v28, %s2432_s24 }
 0x27c   : > { %1328 = vrot.lane.b32.xlu1 %v2762_v30, %s2429_s7  ;;  %s2440_s7 = smov 16  }
 0x284   : > { %1456 = vrot.lane.b32.xlu1 %v2762_v30, %s2433_s2 }
 0x2ce   : > { %v1117_v31 = vpop.permute.xlu0 %1116  ;;  %v1041_v32 = vpop.permute.xlu1 %1040 }
 0x2cf   : > { %2188 = vmatpush.xpose.msk.msra.mxu1 %vm1042_vm10, %v1041_v32 }
 0x2d2   : > { %2189 = vmatmul.msk.f32.vlgmr.msra.gmra.mxu1 %vm1042_vm10, %v2756_v28 }
 0x2d3   : > { %1137 = vmatpush.msrb.mxu1 %v1117_v31 }
 0x2d6   : > { %v1199_v33 = vpop.permute.xlu1 %1198  ;;  %v1301_v51 = vpop.permute.xlu0 %1300 }
 0x2de   : > { %v1171_v34 = vpop.permute.xlu1 %1170  ;;  %v1431_v55 = vpop.permute.xlu0 %1430 }
 0x2df   : > { %2194 = vmatpush.xpose.msk.msra.mxu1 %vm1042_vm10, %v1171_v34 }
 0x2e6   : > { %v1299_v44 = vpop.permute.xlu1 %1298 }
 0x2ee   : > { %v1329_v45 = vpop.permute.xlu1 %1328 }
 0x2ef   : > { %2202 = vmatpush.xpose.msk.msrb.mxu0 %vm1042_vm10, %v1329_v45 }
 0x2f6   : > { %v1457_v5 = vpop.permute.xlu1 %1456 }
 0x34f   : > { %v1064_v41 = vpop.f32.mrf.mxu1 }
 0x350   : > { %v1065_v42 = vadd.f32 %v1064_v41, %v2777_v40 }
 0x352   : > { %v1094_v43 = vsel %vm1042_vm10, %v1065_v42, -inf }
 0x353   : > { %1095 = vmax.xlane.f32.xlu2 %v1094_v43 }
 0x36b   : > { %1068 = vrot.lane.b32.xlu2 %v2762_v30, %s2428_s20  ;;  %s2439_s20 = smov 8  }
 0x373   : > { %1196 = vrot.lane.b32.xlu2 %v2762_v30, %s2435_s25 }
 0x37b   : > { %1168 = vrot.lane.b32.xlu2 %v2756_v28, %s2435_s25 }
 0x383   : > { %1428 = vrot.lane.b32.xlu2 %v2756_v28, %s2433_s2 }
 0x38b   : > { %1458 = vrot.lane.b32.xlu2 %v2762_v30, %s2431_s0  ;;  %s3063_s0 = sld [smem:[#allocation20_spill]] (!%p2220_p5) }
 0x3c6   : > { %v1096_v46 = vpop.xlane.xlu2 %1095 }
 0x3c7   : > { %v1100_v48 = vsub.f32 %v1065_v42, %v1096_v46 }
 0x3c9   : > { %v1102_v49 = vmul.f32 1.442695, %v1100_v48 }
 0x3cb   : > { %2306 = vpow2.f32 %v1102_v49 }
 0x3ce   : > { %v1069_v50 = vpop.permute.xlu2 %1068 }
 0x3cf   : > { %2190 = vmatpush.xpose.msk.msra.mxu2 %vm1042_vm10, %v1069_v50 }
 0x3d1   : > { %v2307_v52 = vpop.eup %2306 }
 0x3d2   : > { %2191 = vmatmul.msk.f32.vlgmr.msra.gmra.mxu2 %vm1042_vm10, %v2762_v30  ;;  %v1106_v53 = vsel %vm1042_vm10, %v2307_v52, 0.0 }
 0x3d3   : > { %2196 = vmatpush.xpose.msk.msrb.mxu2 %vm1042_vm10, %v1199_v33  ;;  %1107 = vadd.xlane.f32.xlu0 %v1106_v53 }
 0x3d6   : > { %v1197_v54 = vpop.permute.xlu2 %1196 }
 0x3d7   : > { %2200 = vmatpush.xpose.msk.msra.mxu2 %vm1042_vm10, %v1301_v51 }
 0x3da   : > { %2197 = vmatmul.msk.f32.vlgmr.msrb.gmra.mxu2 %vm1042_vm10, %v1197_v54 }
 0x3db   : > { %2206 = vmatpush.xpose.msk.msrb.mxu2 %vm1042_vm10, %v1431_v55 }
 0x3de   : > { %v1169_v56 = vpop.permute.xlu2 %1168 }
 0x3e2   : > { %2201 = vmatmul.msk.f32.vlgmr.msra.gmra.mxu2 %vm1042_vm10, %v1299_v44 }
 0x3e6   : > { %v1429_v57 = vpop.permute.xlu2 %1428 }
 0x3e7   : > { %1326 = vrot.lane.b32.xlu0 %v2762_v30, %s2432_s24  ;;  %s3060_s24 = scalar_lea.vmem %s3013_s8, %s2571_s29 }
 0x3ea   : > { %2207 = vmatmul.msk.f32.vlgmr.msrb.gmra.mxu2 %vm1042_vm10, %v1429_v57 }
 0x3ee   : > { %v1459_v58 = vpop.permute.xlu2 %1458 }
 0x3ef   : > { %2208 = vmatpush.xpose.msk.msra.mxu0 %vm1042_vm10, %v1459_v58 }
 0x446   : > { %v1108_v59 = vpop.xlane.xlu0 %1107 }
 0x447   : > { %2308 = vrcp.f32 %v1108_v59 }
 0x44d   : > { %v2309_v60 = vpop.eup %2308 }
 0x44e   : > { %v1114_v61 = vmul.f32 %v2309_v60, %v2307_v52 }
 0x450   : > { %2192 = vmatmul.msk.f32.vlgmr.msrb.gmra.mxu1 %vm1042_vm10, %v1114_v61 }
 0x455   : > { %v1091_v62 = vpop.f32.mrf.mxu2 }
 0x456   : > { %v1092_v63 = vadd.f32 %v1091_v62, %v2777_v40  ;;  %v2287_v62 = vpack.i.bf16 %v2762_v30, %v2756_v28 }
 0x458   : > { %2195 = vmatmul.msk.f32.vlgmr.msra.gmra.mxu1 %vm1042_vm10, %v1169_v56  ;;  %v1097_v0 = vsel %vm1042_vm10, %v1092_v63, -inf }
 0x459   : > { %v1327_v1 = vpop.permute.xlu0 %1326  ;;  %1098 = vmax.xlane.f32.xlu0 %v1097_v0 }
 0x45a   : > { %2203 = vmatmul.msk.f32.vlgmr.msrb.gmra.mxu0 %vm1042_vm10, %v1327_v1 }
 0x45d   : > { %v1221_v2 = vpop.f32.mrf.mxu2 }
 0x45e   : > { %v1222_v3 = vadd.f32 %v1221_v2, %v2777_v40 }
 0x460   : > { %v1227_v4 = vsel %vm1042_vm10, %v1222_v3, -inf }
 0x461   : > { %1228 = vmax.xlane.f32.xlu0 %v1227_v4 }
 0x462   : > { %2209 = vmatmul.msk.f32.vlgmr.msra.gmra.mxu0 %vm1042_vm10, %v1457_v5 }
 0x465   : > { %v1323_v6 = vpop.f32.mrf.mxu2 }
 0x466   : > { %v1324_v7 = vadd.f32 %v1323_v6, %v2777_v40 }
 0x468   : > { %v1354_v8 = vsel %vm1042_vm10, %v1324_v7, -inf }
 0x469   : > { %1355 = vmax.xlane.f32.xlu1 %v1354_v8 }
 0x46d   : > { %v1453_v17 = vpop.f32.mrf.mxu2 }
 0x46e   : > { %v1454_v20 = vadd.f32 %v1453_v17, %v2777_v40 }
 0x470   : > { %v1484_v25 = vsel %vm1042_vm10, %v1454_v20, -inf }
 0x4cc   : > { %v1099_v10 = vpop.xlane.xlu0 %1098 }
 0x4cd   : > { %v2812_v9 = vpop.f32.mrf.mxu1  ;;  %v1101_v13 = vsub.f32 %v1092_v63, %v1099_v10 }
 0x4cf   : > { %v1104_v19 = vmul.f32 1.442695, %v1101_v13 }
 0x4d1   : > { %2310 = vpow2.f32 %v1104_v19 }
 0x4d4   : > { %v1229_v29 = vpop.xlane.xlu0 %1228 }
 0x4d5   : > { %v1193_v11 = vpop.f32.mrf.mxu1  ;;  %v1231_v32 = vsub.f32 %v1222_v3, %v1229_v29 }
 0x4d6   : > { %v1194_v12 = vadd.f32 %v1193_v11, %v2777_v40 }
 0x4d7   : > { %v1351_v14 = vpop.f32.mrf.mxu0  ;;  %v2311_v31 = vpop.eup %2310  ;;  %v1234_v34 = vmul.f32 1.442695, %v1231_v32 }
 0x4d8   : > { %v1352_v15 = vadd.f32 %v1351_v14, %v2777_v40  ;;  %v1224_v16 = vsel %vm1042_vm10, %v1194_v12, -inf  ;;  %v1109_v33 = vsel %vm1042_vm10, %v2311_v31, 0.0 }
 0x4d9   : > { %1225 = vmax.xlane.f32.xlu2 %v1224_v16 }
 0x4da   : > { %v1357_v18 = vsel %vm1042_vm10, %v1352_v15, -inf }
 0x4db   : > { %1358 = vmax.xlane.f32.xlu1 %v1357_v18 }
 0x4dc   : > { %v1356_v21 = vpop.xlane.xlu1 %1355 }
 0x4dd   : > { %v1360_v22 = vsub.f32 %v1324_v7, %v1356_v21 }
 0x4df   : > { %v1481_v23 = vpop.f32.mrf.mxu0  ;;  %v1362_v27 = vmul.f32 1.442695, %v1360_v22 }
 0x4e0   : > { %v1482_v24 = vadd.f32 %v1481_v23, %v2777_v40 }
 0x4e1   : > { %1485 = vmax.xlane.f32.xlu2 %v1484_v25  ;;  %2312 = vpow2.f32 %v1362_v27 }
 0x4e2   : > { %v1487_v26 = vsel %vm1042_vm10, %v1482_v24, -inf  ;;  %2314 = vpow2.f32 %v1234_v34 }
 0x4e3   : > { %1488 = vmax.xlane.f32.xlu0 %v1487_v26 }
 0x4e7   : > { %v2823_v35 = vpop.eup %2312 }
 0x4e8   : > { %v1366_v36 = vsel %vm1042_vm10, %v2823_v35, 0.0  ;;  %v2827_v39 = vpop.eup %2314 }
 0x4e9   : > { %1110 = vadd.xlane.f32.xlu2 %v1109_v33  ;;  %v1239_v40 = vsel %vm1042_vm10, %v2827_v39, 0.0 }
 0x4f1   : > { %1367 = vadd.xlane.f32.xlu2 %v1366_v36  ;;  %v1593_v36 = vld [vmem:[%s2594_s19 + $0x18] sm:$0xff] }
 0x4f2   : > { %1616 = vmatpush.msra.mxu2 %v1593_v36 }
 0x4f7   : > { %1142 = vrot.lane.b32.xlu0 %v2762_v30, %s2427_s18  ;;  %s2438_s18 = smov 56  }
 0x4f9   : > { %1240 = vadd.xlane.f32.xlu2 %v1239_v40  ;;  %v1591_v40 = vld [vmem:[%s2594_s19 + $0x8] sm:$0xff] }
 0x4ff   : > { %1376 = vrot.lane.b32.xlu0 %v2756_v28, %s2436_s21 }
 0x507   : > { %1506 = vrot.lane.b32.xlu0 %v2756_v28, %s2437_s22 }
 0x50f   : > { %1532 = vrot.lane.b32.xlu0 %v2762_v30, %s2437_s22 }
 0x54c   : > { %v1226_v41 = vpop.xlane.xlu2 %1225 }
 0x54d   : > { %v1230_v42 = vsub.f32 %v1194_v12, %v1226_v41  ;;  %v1590_v41 = vld [vmem:[%s2594_s19] sm:$0xff] }
 0x54e   : > { %v1359_v44 = vpop.xlane.xlu1 %1358 }
 0x54f   : > { %v1232_v43 = vmul.f32 1.442695, %v1230_v42  ;;  %v1361_v49 = vsub.f32 %v1352_v15, %v1359_v44 }
 0x551   : > { %2316 = vpow2.f32 %v1232_v43  ;;  %v1364_v52 = vmul.f32 1.442695, %v1361_v49 }
 0x554   : > { %v1486_v45 = vpop.xlane.xlu2 %1485 }
 0x555   : > { %v1490_v46 = vsub.f32 %v1454_v20, %v1486_v45 }
 0x556   : > { %v1489_v56 = vpop.xlane.xlu0 %1488 }
 0x557   : > { %v2317_v48 = vpop.eup %2316  ;;  %v1492_v50 = vmul.f32 1.442695, %v1490_v46  ;;  %v1491_v63 = vsub.f32 %v1482_v24, %v1489_v56 }
 0x558   : > { %v1236_v51 = vsel %vm1042_vm10, %v2317_v48, 0.0 }
 0x559   : > { %2318 = vpow2.f32 %v1492_v50  ;;  %1237 = vadd.xlane.f32.xlu1 %v1236_v51  ;;  %v1494_v0 = vmul.f32 1.442695, %v1491_v63 }
 0x55a   : > { %2320 = vpow2.f32 %v1364_v52 }
 0x55c   : > { %v1111_v53 = vpop.xlane.xlu2 %1110 }
 0x55d   : > { %2322 = vrcp.f32 %v1111_v53 }
 0x55e   : > { %2324 = vpow2.f32 %v1494_v0 }
 0x55f   : > { %v2319_v54 = vpop.eup %2318 }
 0x560   : > { %v1496_v55 = vsel %vm1042_vm10, %v2319_v54, 0.0  ;;  %v2321_v57 = vpop.eup %2320 }
 0x561   : > { %1497 = vadd.xlane.f32.xlu2 %v1496_v55  ;;  %v1369_v59 = vsel %vm1042_vm10, %v2321_v57, 0.0 }
 0x563   : > { %v2323_v58 = vpop.eup %2322 }
 0x564   : > { %v1115_v61 = vmul.f32 %v2323_v58, %v2311_v31  ;;  %v2325_v1 = vpop.eup %2324  ;;  %v1368_v3 = vpop.xlane.xlu2 %1367 }
 0x565   : > { %v1499_v2 = vsel %vm1042_vm10, %v2325_v1, 0.0 }
 0x569   : > { %v1143_v60 = vpop.permute.xlu0 %1142  ;;  %1370 = vadd.xlane.f32.xlu2 %v1369_v59 }
 0x56a   : > { %1163 = vmatpush.msra.mxu3 %v1143_v60 }
 0x56b   : > { %2193 = vmatmul.msk.f32.vlgmr.msra.gmra.mxu3 %vm1042_vm10, %v1115_v61 }
 0x56c   : > { %v1241_v4 = vpop.xlane.xlu2 %1240 }
 0x56d   : > { %2326 = vrcp.f32 %v1241_v4 }
 0x571   : > { %v1377_v6 = vpop.permute.xlu0 %1376 }
 0x572   : > { %2288 = vrot.lane.b32.xlu1 %v2287_v62, %s2438_s18 }
 0x573   : > { %v2327_v10 = vpop.eup %2326 }
 0x574   : > { %v1245_v14 = vmul.f32 %v2327_v10, %v2827_v39  ;;  %v1592_v39 = vld [vmem:[%s2594_s19 + $0x10] sm:$0xff] }
 0x575   : > { %1617 = vmatpush.msra.mxu2 %v1592_v39  ;;  %v1691_v10 = vld [vmem:[%s2611_s4 + $0x10] sm:$0xff] }
 0x577   : > { %1618 = vmatpush.msra.mxu2 %v1591_v40 }
 0x579   : > { %v1507_v8 = vpop.permute.xlu0 %1506  ;;  %1619 = vmatpush.msra.mxu2 %v1590_v41 }
 0x581   : > { %1402 = vrot.lane.b32.xlu2 %v2762_v30, %s2436_s21  ;;  %v1533_v17 = vpop.permute.xlu0 %1532 }
 0x59c   : > { %1500 = vadd.xlane.f32.xlu1 %v1499_v2 }
 0x5cc   : > { %v1238_v7 = vpop.xlane.xlu1 %1237 }
 0x5cd   : > { %2328 = vrcp.f32 %v1238_v7 }
 0x5ce   : > { %2330 = vrcp.f32 %v1368_v3 }
 0x5d3   : > { %v2329_v11 = vpop.eup %2328 }
 0x5d4   : > { %v1498_v5 = vpop.xlane.xlu2 %1497  ;;  %v1244_v15 = vmul.f32 %v2329_v11, %v2317_v48  ;;  %v2331_v18 = vpop.eup %2330  ;;  %v1690_v11 = vld [vmem:[%s2611_s4 + $0x8] sm:$0xff] }
 0x5d5   : > { %v1374_v20 = vmul.f32 %v2331_v18, %v2823_v35 }
 0x5dc   : > { %v1371_v28 = vpop.xlane.xlu2 %1370 }
 0x5dd   : > { %2332 = vrcp.f32 %v1371_v28 }
 0x5de   : > { %2334 = vrcp.f32 %v1498_v5 }
 0x5e3   : > { %v2333_v19 = vpop.eup %2332 }
 0x5e4   : > { %v2289_v30 = vpop.permute.xlu1 %2288  ;;  %v1403_v16 = vpop.permute.xlu2 %1402  ;;  %v1375_v21 = vmul.f32 %v2333_v19, %v2321_v57 }
 0x5e5   : > { %v2291_v12 = vunpack.i.h.bf16 %v2289_v30  ;;  %v2290_v13 = vunpack.i.l.bf16 %v2289_v30  ;;  %v2335_v22 = vpop.eup %2334  ;;  %v1689_v30 = vld [vmem:[%s2611_s4] sm:$0xff] }
 0x5e6   : > { %v1504_v23 = vmul.f32 %v2335_v22, %v2319_v54 }
 0x5e7   : > { %1267 = vmatpush.msrb.mxu3 %v2290_v13  ;;  %1293 = vmatpush.msrb.mxu1 %v2291_v12 }
 0x5e8   : > { %2198 = vmatmul.msk.f32.vlgmr.msrb.gmra.mxu3 %vm1042_vm10, %v1244_v15  ;;  %2199 = vmatmul.msk.f32.vlgmr.msrb.gmra.mxu1 %vm1042_vm10, %v1245_v14 }
 0x5e9   : > { %1397 = vmatpush.msra.mxu3 %v1377_v6  ;;  %1423 = vmatpush.msra.mxu1 %v1403_v16 }
 0x5eb   : > { %1527 = vmatpush.msrb.mxu3 %v1507_v8  ;;  %1553 = vmatpush.msrb.mxu1 %v1533_v17  ;;  %v1692_v8 = vld [vmem:[%s2611_s4 + $0x18] sm:$0xff] }
 0x5ec   : > { %1715 = vmatpush.msrb.mxu0 %v1692_v8 }
 0x5ee   : > { %v1165_v27 = vpop.f32.mrf.mxu3  ;;  %1716 = vmatpush.msrb.mxu0 %v1691_v10 }
 0x5f0   : > { %2204 = vmatmul.msk.f32.vlgmr.msra.gmra.mxu3 %vm1042_vm10, %v1374_v20  ;;  %2205 = vmatmul.msk.f32.vlgmr.msra.gmra.mxu1 %vm1042_vm10, %v1375_v21  ;;  %v2296_v21 = vld [vmem:[%s821_s6] ss:$0 sm:$0xff]  ;;  %s3061_s6 = sld [smem:[#allocation19_spill]] (!%p2220_p5) }
 0x5f1   : > { %1717 = vmatpush.msrb.mxu0 %v1690_v11 }
 0x5f3   : > { %1718 = vmatpush.msrb.mxu0 %v1689_v30 }
 0x5f8   : > { %2210 = vmatmul.msk.f32.vlgmr.msrb.gmra.mxu3 %vm1042_vm10, %v1504_v23 }
 0x60f   : > { %v1501_v24 = vpop.xlane.xlu1 %1500 }
 0x610   : > { %2336 = vrcp.f32 %v1501_v24  ;;  %v2297_v24 = vld [vmem:[%s824_s27] ss:$0 sm:$0xff] }
 0x616   : > { %v2337_v25 = vpop.eup %2336 }
 0x617   : > { %v1505_v26 = vmul.f32 %v2337_v25, %v2325_v1 }
 0x619   : > { %2211 = vmatmul.msk.f32.vlgmr.msrb.gmra.mxu1 %vm1042_vm10, %v1505_v26 }
 0x665   : > { %v1295_v32 = vpop.f32.mrf.mxu1 }
 0x66b   : > { %v1269_v29 = vpop.f32.mrf.mxu3 }
 0x66c   : > { %1560 = vrot.lane.b32.xlu0 %v1269_v29, %s2439_s20 }
 0x66d   : > { %v1425_v34 = vpop.f32.mrf.mxu1 }
 0x673   : > { %v1399_v31 = vpop.f32.mrf.mxu3 }
 0x674   : > { %1568 = vrot.lane.b32.xlu0 %v1399_v31, %s2440_s7 }
 0x67b   : > { %v1529_v33 = vpop.f32.mrf.mxu3 }
 0x67c   : > { %1562 = vrot.lane.b32.xlu0 %v1295_v32, %s2439_s20  ;;  %1576 = vrot.lane.b32.xlu2 %v1529_v33, %s2441_s23 }
 0x684   : > { %1570 = vrot.lane.b32.xlu2 %v1425_v34, %s2440_s7  ;;  %s3062_s7 = sld [smem:[#allocation18_spill]] (!%p2220_p5) }
 0x696   : > { %v1555_v35 = vpop.f32.mrf.mxu1 }
 0x697   : > { %1578 = vrot.lane.b32.xlu0 %v1555_v35, %s2441_s23 }
 0x6d6   : > { %v1577_v45 = vpop.permute.xlu2 %1576 }
 0x6de   : > { %v1561_v42 = vpop.permute.xlu0 %1560  ;;  %v1571_v51 = vpop.permute.xlu2 %1570 }
 0x6df   : > { %v1582_v43 = vsel %vm1042_vm10, %v2812_v9, %v1561_v42  ;;  %v2295_v9 = vld [vmem:[%s3060_s24] ss:$0 sm:$0xff] }
 0x6e6   : > { %v1569_v44 = vpop.permute.xlu0 %1568 }
 0x6e7   : > { %v1585_v46 = vsel %vm1584_vm12, %v1582_v43, %v1569_v44  ;;  %v2298_v44 = vld [vmem:[%s832_s3] ss:$0 sm:$0xff] }
 0x6e8   : > { %v1588_v48 = vsel %vm1587_vm13, %v1585_v46, %v1577_v45 }
 0x6e9   : > { %2212 = vmatmul.msk.f32.vlgmr.msra.gmra.mxu2 %vm940_vm2, %v1588_v48 }
 0x6ee   : > { %v1563_v49 = vpop.permute.xlu0 %1562 }
 0x6ef   : > { %v1583_v50 = vsel %vm1042_vm10, %v1165_v27, %v1563_v49 }
 0x6f0   : > { %v1586_v53 = vsel %vm1584_vm12, %v1583_v50, %v1571_v51  ;;  %v1821_v51 = vld [vmem:[%s2621_s1 + $0x38] sm:$0xff] }
 0x6f1   : > { %1841 = vmatpush.msra.mxu3 %v1821_v51 }
 0x709   : > { %v1579_v52 = vpop.permute.xlu0 %1578 }
 0x70a   : > { %v1589_v54 = vsel %vm1587_vm13, %v1586_v53, %v1579_v52 }
 0x70b   : > { %2213 = vmatmul.msk.f32.gmra.mxu2 %vm940_vm2, %v1589_v54  ;;  %v1820_v54 = vld [vmem:[%s2621_s1 + $0x30] sm:$0xff] }
 0x70c   : > { %1842 = vmatpush.msra.mxu3 %v1820_v54 }
 0x76c   : > { %v1621_v55 = vpop.f32.mrf.mxu2 }
 0x76d   : > { %v1622_v56 = vadd.f32 %v2295_v9, %v1621_v55 }
 0x76f   : > { %v1627_v57 = vadd.f32 %v1622_v56, %v2717_v37  ;;  %v1819_v56 = vld [vmem:[%s2621_s1 + $0x28] sm:$0xff] }
 0x770   : > { %1843 = vmatpush.msra.mxu3 %v1819_v56 }
 0x771   : > { %1629 = vst.msk [vmem:[#allocation2] sm:$0xff] %vm940_vm2, %v1627_v57 }
 0x778   : > { %v2870_v58 = vld [vmem:[#allocation2] sm:$0xff] }
 0x779   : > { %v1635_v59 = vsel %vm940_vm2, %v2870_v58, 0.0 }
 0x77a   : > { %1636 = vadd.xlane.f32.xlu1 %v1635_v59 }
 0x78e   : > { %v1624_v60 = vpop.f32.mrf.mxu2 }
 0x78f   : > { %v1625_v61 = vadd.f32 %v2295_v9, %v1624_v60  ;;  %v1818_v60 = vld [vmem:[%s2621_s1 + $0x20] sm:$0xff] }
 0x790   : > { %1844 = vmatpush.msra.mxu3 %v1818_v60 }
 0x791   : > { %v1628_v62 = vadd.f32 %v1625_v61, %v2719_v38 }
 0x793   : > { %1630 = vst.msk [vmem:[#allocation2 + $0x8] sm:$0xff] %vm940_vm2, %v1628_v62  ;;  %v1817_v62 = vld [vmem:[%s2621_s1 + $0x18] sm:$0xff] }
 0x794   : > { %1845 = vmatpush.msra.mxu3 %v1817_v62 }
 0x79a   : > { %v2876_v63 = vld [vmem:[#allocation2 + $0x8] sm:$0xff] }
 0x79b   : > { %v1638_v37 = vsel %vm940_vm2, %v2876_v63, 0.0 }
 0x79c   : > { %1639 = vadd.xlane.f32.xlu2 %v1638_v37 }
 0x7ed   : > { %v1637_v0 = vpop.xlane.xlu1 %1636 }
 0x7ee   : > { %v1641_v1 = vmul.f32 %v1637_v0, %v2725_v47 }
 0x7f0   : > { %v1643_v2 = vsub.f32 %v2870_v58, %v1641_v1  ;;  %v1816_v1 = vld [vmem:[%s2621_s1 + $0x10] sm:$0xff] }
 0x7f1   : > { %1846 = vmatpush.msra.mxu3 %v1816_v1 }
 0x7f2   : > { %v1645_v3 = vmul.f32 %v1643_v2, %v1643_v2 }
 0x7f4   : > { %v1647_v38 = vsel %vm940_vm2, %v1645_v3, 0.0  ;;  %v1815_v3 = vld [vmem:[%s2621_s1 + $0x8] sm:$0xff] }
 0x7f5   : > { %1648 = vadd.xlane.f32.xlu0 %v1647_v38  ;;  %1847 = vmatpush.msra.mxu3 %v1815_v3 }
 0x80f   : > { %v1640_v4 = vpop.xlane.xlu2 %1639 }
 0x810   : > { %v1642_v5 = vmul.f32 %v1640_v4, %v2725_v47 }
 0x812   : > { %v1644_v6 = vsub.f32 %v2876_v63, %v1642_v5  ;;  %v1814_v5 = vld [vmem:[%s2621_s1] sm:$0xff] }
 0x813   : > { %1848 = vmatpush.msra.mxu3 %v1814_v5 }
 0x814   : > { %v1646_v7 = vmul.f32 %v1644_v6, %v1644_v6 }
 0x816   : > { %v1650_v28 = vsel %vm940_vm2, %v1646_v7, 0.0 }
 0x817   : > { %1651 = vadd.xlane.f32.xlu1 %v1650_v28 }
 0x868   : > { %v1649_v12 = vpop.xlane.xlu0 %1648 }
 0x869   : > { %v1653_v13 = vmul.f32 %v1649_v12, %v2725_v47 }
 0x86b   : > { %v1655_v14 = vadd.f32 1e-12, %v1653_v13 }
 0x86d   : > { %2338 = vrsqrt.f32 %v1655_v14  ;;  %vm1663_vm15 = vweird.f32 %v1655_v14 }
 0x873   : > { %v2339_v15 = vpop.eup %2338 }
 0x874   : > { %v1658_v16 = vmul.f32 %v2339_v15, %v1655_v14  ;;  %vm1664_vm14 = vweird.f32 %v2339_v15 }
 0x875   : > { %vm1665_vm0 = vmor %vm1663_vm15, %vm1664_vm14 }
 0x876   : > { %v1659_v17 = vmul.f32 %v2339_v15, %v1658_v16 }
 0x878   : > { %v1660_v18 = vmul.f32 0.5, %v1659_v17 }
 0x87a   : > { %v1661_v19 = vsub.f32 1.5, %v1660_v18 }
 0x87c   : > { %v1662_v20 = vmul.f32 %v2339_v15, %v1661_v19 }
 0x87e   : > { %v1666_v22 = vsel %vm1665_vm0, %v2339_v15, %v1662_v20 }
 0x87f   : > { %v1677_v23 = vmul.f32 %v1666_v22, %v1643_v2 }
 0x881   : > { %v1682_v25 = vmul.f32 %v2296_v21, %v1677_v23 }
 0x883   : > { %v1687_v26 = vadd.f32 %v2297_v24, %v1682_v25 }
 0x885   : > { %2214 = vmatmul.msk.f32.vlgmr.msrb.gmra.mxu0 %vm940_vm2, %v1687_v26 }
 0x88a   : > { %v1652_v27 = vpop.xlane.xlu1 %1651 }
 0x88b   : > { %v1654_v29 = vmul.f32 %v1652_v27, %v2725_v47 }
 0x88d   : > { %v1656_v31 = vadd.f32 1e-12, %v1654_v29 }
 0x88f   : > { %2340 = vrsqrt.f32 %v1656_v31  ;;  %vm1673_vm3 = vweird.f32 %v1656_v31 }
 0x895   : > { %v2341_v32 = vpop.eup %2340 }
 0x896   : > { %v1668_v33 = vmul.f32 %v2341_v32, %v1656_v31  ;;  %vm1674_vm1 = vweird.f32 %v2341_v32 }
 0x897   : > { %vm1675_vm4 = vmor %vm1673_vm3, %vm1674_vm1 }
 0x898   : > { %v1669_v34 = vmul.f32 %v2341_v32, %v1668_v33 }
 0x89a   : > { %v1670_v35 = vmul.f32 0.5, %v1669_v34 }
 0x89c   : > { %v1671_v36 = vsub.f32 1.5, %v1670_v35 }
 0x89e   : > { %v1672_v39 = vmul.f32 %v2341_v32, %v1671_v36 }
 0x8a0   : > { %v1676_v40 = vsel %vm1675_vm4, %v2341_v32, %v1672_v39 }
 0x8a1   : > { %v1678_v41 = vmul.f32 %v1676_v40, %v1644_v6 }
 0x8a3   : > { %v1683_v42 = vmul.f32 %v2296_v21, %v1678_v41 }
 0x8a5   : > { %v1688_v43 = vadd.f32 %v2297_v24, %v1683_v42 }
 0x8a7   : > { %2215 = vmatmul.msk.f32.gmra.mxu0 %vm940_vm2, %v1688_v43 }
 0x902   : > { %v1720_v45 = vpop.f32.mrf.mxu0 }
 0x903   : > { %v2909_v46 = vadd.f32 %v2298_v44, %v1720_v45 }
 0x905   : > { %v1728_v48 = vmul.f32 0.70710677, %v2909_v46  ;;  %v1726_v42 = vmul.f32 0.5, %v2909_v46 }
 0x907   : > { %v1730_v49 = vmul.f32 %v1728_v48, %v1728_v48 }
 0x909   : > { %v1731_v50 = vmin.f32 %v1730_v49, 16.0 }
 0x90b   : > { %v1732_v52 = vmul.f32 2.1237322e-06, %v1731_v50  ;;  %v1743_v53 = vmul.f32 3.8918573e-05, %v1731_v50 }
 0x90d   : > { %v1733_v9 = vadd.f32 0.00028619796, %v1732_v52  ;;  %v1744_v55 = vadd.f32 0.001143296, %v1743_v53 }
 0x90f   : > { %v1734_v57 = vmul.f32 %v1733_v9, %v1731_v50  ;;  %v1745_v59 = vmul.f32 %v1744_v55, %v1731_v50 }
 0x911   : > { %v1746_v61 = vadd.f32 0.014752088, %v1745_v59  ;;  %v1735_v37 = vadd.f32 0.0036580483, %v1734_v57 }
 0x913   : > { %v1747_v0 = vmul.f32 %v1746_v61, %v1731_v50  ;;  %v1736_v38 = vmul.f32 %v1735_v37, %v1731_v50 }
 0x915   : > { %v1748_v2 = vadd.f32 0.112945676, %v1747_v0  ;;  %v1737_v7 = vadd.f32 0.05243302, %v1736_v38 }
 0x917   : > { %v1749_v4 = vmul.f32 %v1748_v2, %v1731_v50  ;;  %v1738_v10 = vmul.f32 %v1737_v7, %v1731_v50 }
 0x919   : > { %v1750_v6 = vadd.f32 0.4994258, %v1749_v4  ;;  %v1739_v11 = vadd.f32 0.18741608, %v1738_v10  ;;  %v2299_v10 = vld [vmem:[%s840_s26] ss:$0 sm:$0xff] }
 0x91b   : > { %v1751_v28 = vmul.f32 %v1750_v6, %v1731_v50  ;;  %v1740_v14 = vmul.f32 %v1739_v11, %v1731_v50 }
 0x91d   : > { %v1752_v8 = vadd.f32 1.0, %v1751_v28  ;;  %v1741_v20 = vadd.f32 1.1283791, %v1740_v14 }
 0x91f   : > { %2342 = vrcp.f32 %v1752_v8  ;;  %v1764_v18 = vand.u32 2147483648, %v1752_v8  ;;  %v1762_v22 = vand.u32 2147483647, %v1752_v8  ;;  %vm1758_vm6 = vweird.f32 %v1752_v8 }
 0x920   : > { %v1742_v29 = vmul.f32 %v1741_v20, %v1728_v48 }
 0x921   : > { %v1765_v25 = vor.u32 1.1754944e-38, %v1764_v18  ;;  %vm1763_vm8 = vcmp.eq.f32.partialorder %v1762_v22, 8.507059e+37 }
 0x924   : > { %v1723_v30 = vpop.f32.mrf.mxu0 }
 0x925   : > { %v2343_v12 = vpop.eup %2342  ;;  %v2920_v13 = vadd.f32 %v2298_v44, %v1723_v30 }
 0x926   : > { %v1754_v15 = vmul.f32 %v2343_v12, %v1752_v8  ;;  %vm1759_vm5 = vweird.f32 %v2343_v12 }
 0x927   : > { %v1729_v16 = vmul.f32 0.70710677, %v2920_v13  ;;  %vm1760_vm7 = vmor %vm1758_vm6, %vm1759_vm5  ;;  %v1727_v7 = vmul.f32 0.5, %v2920_v13 }
 0x928   : > { %v1755_v17 = vsub.f32 1.0, %v1754_v15 }
 0x929   : > { %v1770_v19 = vmul.f32 %v1729_v16, %v1729_v16 }
 0x92a   : > { %v1756_v21 = vmul.f32 %v2343_v12, %v1755_v17 }
 0x92b   : > { %v1771_v23 = vmin.f32 %v1770_v19, 16.0 }
 0x92c   : > { %v1757_v24 = vadd.f32 %v2343_v12, %v1756_v21 }
 0x92d   : > { %v1772_v26 = vmul.f32 2.1237322e-06, %v1771_v23  ;;  %v1783_v27 = vmul.f32 3.8918573e-05, %v1771_v23 }
 0x92e   : > { %v1761_v31 = vsel %vm1760_vm7, %v2343_v12, %v1757_v24 }
 0x92f   : > { %v1766_v32 = vsel %vm1763_vm8, %v1765_v25, %v1761_v31  ;;  %v1773_v33 = vadd.f32 0.00028619796, %v1772_v26  ;;  %v1784_v34 = vadd.f32 0.001143296, %v1783_v27 }
 0x930   : > { %v1767_v35 = vmul.f32 %v1766_v32, %v1742_v29 }
 0x931   : > { %v1774_v36 = vmul.f32 %v1773_v33, %v1771_v23  ;;  %v1785_v39 = vmul.f32 %v1784_v34, %v1771_v23 }
 0x932   : > { %v2216_v40 = vclamps-f32 %v1767_v35, 1.0 }
 0x933   : > { %v1786_v41 = vadd.f32 0.014752088, %v1785_v39  ;;  %v1775_v44 = vadd.f32 0.0036580483, %v1774_v36 }
 0x934   : > { %v1810_v43 = vadd.f32 1.0, %v2216_v40 }
 0x935   : > { %v1787_v45 = vmul.f32 %v1786_v41, %v1771_v23  ;;  %v1776_v51 = vmul.f32 %v1775_v44, %v1771_v23 }
 0x936   : > { %v1812_v49 = vmul.f32 %v1810_v43, %v1726_v42 }
 0x937   : > { %v1788_v50 = vadd.f32 0.112945676, %v1787_v45  ;;  %v1777_v53 = vadd.f32 0.05243302, %v1776_v51 }
 0x938   : > { %2218 = vmatmul.msk.f32.vlgmr.msra.gmra.mxu3 %vm1826_vm9, %v1812_v49 }
 0x939   : > { %v1789_v48 = vmul.f32 %v1788_v50, %v1771_v23  ;;  %v1778_v55 = vmul.f32 %v1777_v53, %v1771_v23 }
 0x93b   : > { %v1790_v52 = vadd.f32 0.4994258, %v1789_v48  ;;  %v1779_v56 = vadd.f32 0.18741608, %v1778_v55 }
 0x93d   : > { %v1791_v54 = vmul.f32 %v1790_v52, %v1771_v23  ;;  %v1780_v59 = vmul.f32 %v1779_v56, %v1771_v23 }
 0x93f   : > { %v1792_v9 = vadd.f32 1.0, %v1791_v54  ;;  %v1781_v62 = vadd.f32 1.1283791, %v1780_v59 }
 0x941   : > { %2344 = vrcp.f32 %v1792_v9  ;;  %v1804_v61 = vand.u32 2147483648, %v1792_v9  ;;  %v1802_v0 = vand.u32 2147483647, %v1792_v9  ;;  %vm1798_vm11 = vweird.f32 %v1792_v9 }
 0x942   : > { %v1782_v3 = vmul.f32 %v1781_v62, %v1729_v16 }
 0x943   : > { %v1805_v2 = vor.u32 1.1754944e-38, %v1804_v61  ;;  %vm1803_vm13 = vcmp.eq.f32.partialorder %v1802_v0, 8.507059e+37 }
 0x947   : > { %v2345_v57 = vpop.eup %2344 }
 0x948   : > { %v1794_v46 = vmul.f32 %v2345_v57, %v1792_v9  ;;  %vm1799_vm10 = vweird.f32 %v2345_v57 }
 0x949   : > { %vm1800_vm12 = vmor %vm1798_vm11, %vm1799_vm10 }
 0x94a   : > { %v1795_v60 = vsub.f32 1.0, %v1794_v46 }
 0x94c   : > { %v1796_v37 = vmul.f32 %v2345_v57, %v1795_v60 }
 0x94e   : > { %v1797_v1 = vadd.f32 %v2345_v57, %v1796_v37 }
 0x950   : > { %v1801_v38 = vsel %vm1800_vm12, %v2345_v57, %v1797_v1 }
 0x951   : > { %v1806_v4 = vsel %vm1803_vm13, %v1805_v2, %v1801_v38 }
 0x952   : > { %v1807_v5 = vmul.f32 %v1806_v4, %v1782_v3 }
 0x954   : > { %v2217_v6 = vclamps-f32 %v1807_v5, 1.0 }
 0x956   : > { %v1811_v28 = vadd.f32 1.0, %v2217_v6 }
 0x958   : > { %v1813_v8 = vmul.f32 %v1811_v28, %v1727_v7 }
 0x95a   : > { %2219 = vmatmul.msk.f32.gmra.mxu3 %vm1826_vm9, %v1813_v8 }
 0x9bb   : > { %v1850_v11 = vpop.f32.mrf.mxu3 }
 0x9bc   : > { %v1851_v30 = vadd.f32 %v2299_v10, %v1850_v11 }
 0x9be   : > { %v1856_v12 = vadd.f32 %v1851_v30, %v2870_v58 }
 0x9c0   : > { %1858 = vst.msk [vmem:[#allocation2] sm:$0xff] %vm940_vm2, %v1856_v12 }
 0x9dd   : > { %v1853_v14 = vpop.f32.mrf.mxu3 }
 0x9de   : > { %v1854_v15 = vadd.f32 %v2299_v10, %v1853_v14  ;;  %1863 = sbr.rel (%p2220_p5) target bundleno = 3083 (0xc0b), region = 112 }
 0x9e0   : > { %v1857_v16 = vadd.f32 %v1854_v15, %v2876_v63 }
 0x9e2   : > { %1859 = vst.msk [vmem:[#allocation2 + $0x8] sm:$0xff] %vm940_vm2, %v1857_v16 }
 0x9e3   : > { %v1864_v13 = vld [vmem:[#allocation2] sm:$0xff]  ;;  %vm1871_vm14 = vcmask 1041409   ;;  %vm1874_vm15 = vcmask 254976   ;;  %v1926_v31 = vld [vmem:[%s3022_s17 + $0x18] sm:$0xff]  ;;  %v1925_v32 = vld [vmem:[%s3022_s17 + $0x10] sm:$0xff] }
 0x9e4   : > { %1949 = vmatpush.msra.mxu0 %v1926_v31  ;;  %v1924_v33 = vld [vmem:[%s3022_s17 + $0x8] sm:$0xff]  ;;  %v1923_v34 = vld [vmem:[%s3022_s17] sm:$0xff]  ;;  %v1962_v59 = vld [vmem:[%s3061_s6 + $0x18] sm:$0xff] }
 0x9e5   : > { %v2346_v48 = vld [vmem:[%s3020_s15] ss:$0 sm:$0xff]  ;;  %1982 = vmatpush.msra.mxu1 %v1962_v59  ;;  %v1961_v46 = vld [vmem:[%s3061_s6 + $0x10] sm:$0xff]  ;;  %v1960_v60 = vld [vmem:[%s3061_s6 + $0x8] sm:$0xff] }
 0x9e6   : > { %1950 = vmatpush.msra.mxu0 %v1925_v32  ;;  %v2347_v54 = vld [vmem:[%s3021_s16] ss:$0 sm:$0xff] }
 0x9e7   : > { %1983 = vmatpush.msra.mxu1 %v1961_v46  ;;  %v1959_v61 = vld [vmem:[%s3061_s6] sm:$0xff] }
 0x9e8   : > { %1951 = vmatpush.msra.mxu0 %v1924_v33  ;;  %v2348_v62 = vld [vmem:[%s3062_s7] ss:$0 sm:$0xff] }
 0x9e9   : > { %v1865_v17 = vld [vmem:[#allocation2 + $0x8] sm:$0xff]  ;;  %1984 = vmatpush.msra.mxu1 %v1960_v60  ;;  %v2349_v2 = vld [vmem:[%s3063_s0] ss:$0 sm:$0xff] }
 0x9ea   : > { %v1870_v18 = vrot.slane %v1865_v17, 7  ;;  %1952 = vmatpush.msra.mxu0 %v1923_v34 }
 0x9eb   : > { %1985 = vmatpush.msra.mxu1 %v1959_v61 }
 0x9ec   : > { %v1872_v19 = vsel %vm1871_vm14, %v1870_v18, %v1864_v13 }
 0x9ed   : > { %v1875_v58 = vsel %vm1874_vm15, %v1872_v19, 0.0 }
 0x9ee   : > { %1876 = vadd.xlane.f32.xlu0 %v1875_v58 }
 0xa61   : > { %v1877_v20 = vpop.xlane.xlu0 %1876 }
 0xa62   : > { %v1878_v21 = vmul.f32 %v1877_v20, %v2725_v47 }
 0xa64   : > { %v1880_v22 = vrot.slane %v1878_v21, 1  ;;  %v1883_v63 = vsub.f32 %v1864_v13, %v1878_v21 }
 0xa66   : > { %v1884_v23 = vsub.f32 %v1865_v17, %v1880_v22  ;;  %v1885_v25 = vmul.f32 %v1883_v63, %v1883_v63 }
 0xa68   : > { %v1886_v24 = vmul.f32 %v1884_v23, %v1884_v23 }
 0xa6a   : > { %v1889_v26 = vrot.slane %v1886_v24, 7 }
 0xa6c   : > { %v1890_v27 = vsel %vm1871_vm14, %v1889_v26, %v1885_v25 }
 0xa6d   : > { %v1892_v29 = vsel %vm1874_vm15, %v1890_v27, 0.0 }
 0xa6e   : > { %1893 = vadd.xlane.f32.xlu0 %v1892_v29 }
 0xae1   : > { %v1894_v35 = vpop.xlane.xlu0 %1893 }
 0xae2   : > { %v1895_v36 = vmul.f32 %v1894_v35, %v2725_v47 }
 0xae4   : > { %v1896_v39 = vadd.f32 1e-12, %v1895_v36 }
 0xae6   : > { %2350 = vrsqrt.f32 %v1896_v39  ;;  %vm1903_vm1 = vweird.f32 %v1896_v39 }
 0xaec   : > { %v2351_v40 = vpop.eup %2350 }
 0xaed   : > { %v1898_v41 = vmul.f32 %v2351_v40, %v1896_v39  ;;  %vm1904_vm0 = vweird.f32 %v2351_v40 }
 0xaee   : > { %vm1905_vm3 = vmor %vm1903_vm1, %vm1904_vm0 }
 0xaef   : > { %v1899_v42 = vmul.f32 %v2351_v40, %v1898_v41 }
 0xaf1   : > { %v1900_v43 = vmul.f32 0.5, %v1899_v42 }
 0xaf3   : > { %v1901_v44 = vsub.f32 1.5, %v1900_v43 }
 0xaf5   : > { %v1902_v45 = vmul.f32 %v2351_v40, %v1901_v44 }
 0xaf7   : > { %v1906_v49 = vsel %vm1905_vm3, %v2351_v40, %v1902_v45 }
 0xaf8   : > { %v1908_v50 = vrot.slane %v1906_v49, 1  ;;  %v1911_v51 = vmul.f32 %v1906_v49, %v1883_v63 }
 0xafa   : > { %v1912_v52 = vmul.f32 %v1908_v50, %v1884_v23  ;;  %v1916_v47 = vmul.f32 %v2346_v48, %v1911_v51 }
 0xafc   : > { %v1917_v53 = vmul.f32 %v2346_v48, %v1912_v52  ;;  %v1921_v55 = vadd.f32 %v2347_v54, %v1916_v47 }
 0xafe   : > { %v1922_v9 = vadd.f32 %v2347_v54, %v1917_v53 }
 0xb00   : > { %v1933_v56 = vrot.slane %v1922_v9, 7 }
 0xb02   : > { %v1934_v57 = vsel %vm1871_vm14, %v1933_v56, %v1921_v55 }
 0xb03   : > { %2221 = vmatmul.msk.f32.vlgmr.msra.gmra.mxu0 %vm940_vm2, %v1934_v57 }
 0xb80   : > { %v1954_v37 = vpop.f32.mrf.mxu0 }
 0xb81   : > { %v1955_v0 = vadd.f32 %v2348_v62, %v1954_v37 }
 0xb83   : > { %2352 = vtanh.f32 %v1955_v0 }
 0xb89   : > { %v2353_v1 = vpop.eup %2352 }
 0xb8a   : > { %1958 = vst.msk [vmem:[#allocation3] sm:$0x3] %vm1874_vm15, %v2353_v1  ;;  %2222 = vmatmul.msk.f32.vlgmr.msra.gmra.mxu1 %vm940_vm2, %v2353_v1 }
 0xc07   : > { %v1987_v3 = vpop.f32.mrf.mxu1 }
 0xc08   : > { %v1988_v38 = vadd.f32 %v2349_v2, %v1987_v3 }
 0xc0a   : > { %1990 = vst [vmem:[#allocation5] sm:$0x3] %v1988_v38 }
 0xc0b PF: > { %p2257_p6 = scmp.eq.s32.totalorder %s2565_s28, 1  ;;  %s2442_s24 = smov [#allocation3]  }
 0xc0c   : > { %s1997_s2 = sshll.u32 %s2442_s24, 4  ;;  %s3064_s21 = sld [smem:[#allocation21_spill]]  ;;  %s1998_s2 = int_to_ptr.vmem [resolvable:$true] %s1997_s2 }
 0xc0d   : > { %s3065_s29 = sld [smem:[#allocation22_spill]]  ;;  %s2443_s22 = smov [#allocation5]  }
 0xc0e   : > { %s2009_s18 = sshll.u32 %s2443_s22, 4  ;;  %s2010_s18 = int_to_ptr.vmem [resolvable:$true] %s2009_s18 }
 0xc12   : > { %s1999_s27 = sshll.u32 %s3064_s21, 4  ;;  %s2000_s27 = int_to_ptr.hbm [resolvable:$true] %s1999_s27 }
 0xc13   : > { %2250 = dma.vmem_to_hbm [thread:$0]  (%p2257_p6), %s1998_s2, 32, %s2000_s27, [#allocation4]  }
 0xc14   : > { %s2011_s26 = sshll.u32 %s3065_s29, 4  ;;  %s2012_s26 = int_to_ptr.hbm [resolvable:$true] %s2011_s26 }
 0xc15   : > { %2252 = dma.vmem_to_hbm [thread:$0]  (%p2257_p6), %s2010_s18, 32, %s2012_s26, [#allocation6]  }
 0xc16   : > { %2415 = dma.done.wait (%p2257_p6), [#allocation4], 32  }
 0xc17   : > { %2417 = vsyncadd (%p2257_p6), [#allocation4], 4294967264 }
 0xc18   : > { %2419 = dma.done.wait (%p2257_p6), [#allocation6], 32  }
 0xc19   : > { %2421 = vsyncadd (%p2257_p6), [#allocation6], 4294967264 }
 0xc1a PF: > { %s3066_s20 = sld [smem:[#allocation9_spill]] }
 0xc20   : > { %s35_s3 = sadd.s32 1, %s3066_s20  }
 0xc21   : > { %p32_p7 = scmp.ge.s32.totalorder %s35_s3, 4  }
 0xc23   :  { %34 = sbr.rel (!%p32_p7) target bundleno = 16 (0x10), region = 180 }
 0xc28   :  { %2030 = vsyncpa [#allocation4], 1 }
 0xc29   :  { %2032 = vsyncpa [#allocation4 + $0x1], 1 }
 0xc2a   :  { %2033 = vsyncpa [#allocation6], 1 }

</bundles_post_ra>
